<compile_context>
chip_gen: v6e
topology: v6e:2x2x1
jax: 0.10.0
libtpu: 0.0.40
codegen_flags: <defaults>
</compile_context>

<pallas_src>
import functools

import numpy as np
import jax
import jax.numpy as jnp
from jax.experimental import pallas as pl
from jax.experimental.pallas import tpu as pltpu


def _round_up(x, m):
    return (x + m - 1) // m * m


def _pick_tile(s_pad, cap=2048):
    """Largest multiple of 128 that divides s_pad and is <= cap."""
    best = 128
    t = 128
    while t <= min(s_pad, cap):
        if s_pad % t == 0:
            best = t
        t += 128
    return best


# --------------------------------------------------------------------------- #
# Pallas kernels
# --------------------------------------------------------------------------- #
def _chan_matmul_kernel(x_ref, w_ref, b_ref, o_ref, *, relu):
    # x: (1, K, T)   w: (N, K)   b: (N, 1)   o: (1, N, T)
    x = x_ref[0].astype(jnp.bfloat16)
    w = w_ref[...].astype(jnp.bfloat16)
    acc = jnp.dot(w, x, preferred_element_type=jnp.float32) + b_ref[...]
    if relu:
        acc = jnp.maximum(acc, 0.0)
    o_ref[0] = acc.astype(o_ref.dtype)


def _winmax7_kernel(x_ref, o_ref):
    # stride-1 7x7 window max via hierarchical shifted maxima (pure VPU).
    x = x_ref[0]                                   # (C, H, W)
    h = jnp.maximum(x[:, :-1, :], x[:, 1:, :])     # window 2 along H
    h = jnp.maximum(h[:, :-2, :], h[:, 2:, :])     # window 4
    h = jnp.maximum(h[:, :-3, :], h[:, 3:, :])     # window 7
    v = jnp.maximum(h[:, :, :-1], h[:, :, 1:])     # window 2 along W
    v = jnp.maximum(v[:, :, :-2], v[:, :, 2:])     # window 4
    v = jnp.maximum(v[:, :, :-3], v[:, :, 3:])     # window 7
    o_ref[0] = v


def _bilinear_up_kernel(c3_ref, mh_ref, mw_ref, o_ref):
    # Separable bilinear upsample: (h3, w3) -> (H, W) as two small matmuls.
    n_ch = c3_ref.shape[1]
    mh = mh_ref[...]                               # (H, h3)
    mw = mw_ref[...]                               # (w3, W)
    for c in range(n_ch):                          # f is tiny and static
        t = jnp.dot(c3_ref[0, c], mw, preferred_element_type=jnp.float32)  # (h3, W)
        u = jnp.dot(mh, t, preferred_element_type=jnp.float32)             # (H, W)
        o_ref[0, c] = u.astype(o_ref.dtype)


def _std_branch_kernel(x_ref, w0_ref, b0_ref, w1_ref, b1_ref, scale_ref, o_ref):
    # gate = 1 + scale * sigmoid(W1 @ relu(W0 @ std(x) + b0) + b1), per batch.
    x = x_ref[0]                                   # (C, HW) f32
    n = x.shape[1]
    mean = jnp.sum(x, axis=1, keepdims=True) * (1.0 / n)
    d = x - mean
    var = jnp.sum(d * d, axis=1, keepdims=True) * (1.0 / n)   # population /n
    s = jnp.sqrt(var)                              # (C, 1)
    h = jnp.dot(w0_ref[...], s, preferred_element_type=jnp.float32) + b0_ref[...]
    h = jnp.maximum(h, 0.0)                        # (f, 1)
    y = jnp.dot(w1_ref[...], h, preferred_element_type=jnp.float32) + b1_ref[...]
    y = jax.nn.sigmoid(y)                          # (C, 1)
    o_ref[0] = 1.0 + scale_ref[...] * y            # (C, 1)


def _tail_kernel(x_ref, c1_ref, up_ref, gate_ref,
                 wf_ref, bf_ref, w4_ref, b4_ref, o_ref):
    # cf = conv_f(c1_); c4 = conv4(c3_up + cf); out = x * sigmoid(c4) * gate
    c1 = c1_ref[0]                                 # (f, T) bf16
    cf = jnp.dot(wf_ref[...], c1, preferred_element_type=jnp.float32) + bf_ref[...]
    s = (up_ref[0].astype(jnp.float32) + cf).astype(jnp.bfloat16)          # (f, T)
    c4 = jnp.dot(w4_ref[...], s, preferred_element_type=jnp.float32) + b4_ref[...]
    m = jax.nn.sigmoid(c4)                         # (C, T) f32
    o_ref[0] = (x_ref[0] * m * gate_ref[0]).astype(o_ref.dtype)


# --------------------------------------------------------------------------- #
# Pallas wrappers
# --------------------------------------------------------------------------- #
def conv_channels_matmul(x_cf, wmat, bias, *, relu=False,
                         out_dtype=jnp.float32, max_tile=2048):
    """out[b, :, s] = wmat @ x_cf[b, :, s] + bias  (channels-first 1x1 conv)."""
    B, K, S = x_cf.shape
    N = wmat.shape[0]
    if S >= 128:
        s_pad = _round_up(S, 128)
        if s_pad != S:
            x_cf = jnp.pad(x_cf, ((0, 0), (0, 0), (0, s_pad - S)))
        tile = _pick_tile(s_pad, max_tile)
    else:
        s_pad, tile = S, S
    n_t = s_pad // tile
    out = pl.pallas_call(
        functools.partial(_chan_matmul_kernel, relu=relu),
        out_shape=jax.ShapeDtypeStruct((B, N, s_pad), out_dtype),
        grid=(B, n_t),
        in_specs=[
            pl.BlockSpec((1, K, tile), lambda b, t: (b, 0, t)),
            pl.BlockSpec((N, K), lambda b, t: (0, 0)),
            pl.BlockSpec((N, 1), lambda b, t: (0, 0)),
        ],
        out_specs=pl.BlockSpec((1, N, tile), lambda b, t: (b, 0, t)),
        compiler_params=pltpu.CompilerParams(
            dimension_semantics=("parallel", "parallel"),
            vmem_limit_bytes=32 * 1024 * 1024),
    )(x_cf, wmat.astype(jnp.bfloat16),
      bias.reshape(N, 1).astype(jnp.float32))
    if s_pad != S:
        out = out[:, :, :S]
    return out


def conv3x3_via_taps(x_img, w, b, *, stride=1, padding=0, relu=False,
                     out_dtype=jnp.float32):
    """3x3 conv, channels-first, lowered to a 9-tap channels matmul."""
    # TODO(synk): at large resolutions move the tap gather fully in-kernel
    # (halo'd DMA tile + 9 shifted-slice matmuls) instead of materializing
    # the 9-tap patch tensor in the wrapper.
    B, Cin, H, W = x_img.shape
    Cout = w.shape[0]
    if padding:
        x_img = jnp.pad(x_img, ((0, 0), (0, 0),
                                (padding, padding), (padding, padding)))
    Hp, Wp = x_img.shape[2], x_img.shape[3]
    OH = (Hp - 3) // stride + 1
    OW = (Wp - 3) // stride + 1
    taps, wcols = [], []
    for di in range(3):
        for dj in range(3):
            taps.append(x_img[:, :,
                              di:di + stride * (OH - 1) + 1:stride,
                              dj:dj + stride * (OW - 1) + 1:stride])
            wcols.append(w[:, :, di, dj])
    patches = jnp.concatenate(taps, axis=1).reshape(B, 9 * Cin, OH * OW)
    wmat = jnp.concatenate(wcols, axis=1)          # (Cout, 9*Cin)
    out = conv_channels_matmul(patches, wmat, b, relu=relu, out_dtype=out_dtype)
    return out.reshape(B, Cout, OH, OW)


def maxpool7s3(x_img):
    """F.max_pool2d(kernel_size=7, stride=3): stride-1 window max in Pallas
    followed by a stride-3 subsample in the wrapper."""
    B, C, H1, W1 = x_img.shape
    assert H1 >= 7 and W1 >= 7
    OH = (H1 - 7) // 3 + 1
    OW = (W1 - 7) // 3 + 1
    wm = pl.pallas_call(
        _winmax7_kernel,
        out_shape=jax.ShapeDtypeStruct((B, C, H1 - 6, W1 - 6), x_img.dtype),
        grid=(B,),
        in_specs=[pl.BlockSpec((1, C, H1, W1), lambda b: (b, 0, 0, 0))],
        out_specs=pl.BlockSpec((1, C, H1 - 6, W1 - 6), lambda b: (b, 0, 0, 0)),
        compiler_params=pltpu.CompilerParams(dimension_semantics=("parallel",)),
    )(x_img)
    # TODO(synk): fold the stride-3 subsample into the kernel (strided store).
    return wm[:, :, 0:3 * (OH - 1) + 1:3, 0:3 * (OW - 1) + 1:3]


def _bilinear_matrix_np(in_size, out_size):
    """(in_size, out_size) interpolation matrix matching
    F.interpolate(mode='bilinear', align_corners=False) along one axis.
    Built with numpy -> trace-time constant (no in-graph scatter)."""
    scale = in_size / out_size
    dst = np.arange(out_size)
    src = np.maximum((dst + 0.5) * scale - 0.5, 0.0)
    i0 = np.minimum(np.floor(src).astype(np.int64), in_size - 1)
    i1 = np.minimum(i0 + 1, in_size - 1)
    l1 = src - i0
    l0 = 1.0 - l1
    m = np.zeros((in_size, out_size), np.float32)
    m[i0, dst] += l0
    m[i1, dst] += l1
    return m


def bilinear_upsample(c3, H, W, out_dtype=jnp.bfloat16):
    B, f, h3, w3 = c3.shape
    mh = jnp.asarray(_bilinear_matrix_np(h3, H).T)   # (H, h3)
    mw = jnp.asarray(_bilinear_matrix_np(w3, W))     # (w3, W)
    return pl.pallas_call(
        _bilinear_up_kernel,
        out_shape=jax.ShapeDtypeStruct((B, f, H, W), out_dtype),
        grid=(B,),
        in_specs=[pl.BlockSpec((1, f, h3, w3), lambda b: (b, 0, 0, 0)),
                  pl.BlockSpec((H, h3), lambda b: (0, 0)),
                  pl.BlockSpec((w3, W), lambda b: (0, 0))],
        out_specs=pl.BlockSpec((1, f, H, W), lambda b: (b, 0, 0, 0)),
        compiler_params=pltpu.CompilerParams(dimension_semantics=("parallel",)),
    )(c3.astype(jnp.float32), mh, mw)


def std_branch(x_cf, w0, b0, w1, b1, scale):
    """Fused: per-channel spatial std -> 1x1 conv -> relu -> 1x1 conv ->
    sigmoid -> gate = 1 + scale * sigmoid(...)."""
    B, C, HW = x_cf.shape
    f = w0.shape[0]
    return pl.pallas_call(
        _std_branch_kernel,
        out_shape=jax.ShapeDtypeStruct((B, C, 1), jnp.float32),
        grid=(B,),
        in_specs=[
            pl.BlockSpec((1, C, HW), lambda b: (b, 0, 0)),
            pl.BlockSpec((f, C), lambda b: (0, 0)),
            pl.BlockSpec((f, 1), lambda b: (0, 0)),
            pl.BlockSpec((C, f), lambda b: (0, 0)),
            pl.BlockSpec((C, 1), lambda b: (0, 0)),
            pl.BlockSpec((1, 1), lambda b: (0, 0)),
        ],
        out_specs=pl.BlockSpec((1, C, 1), lambda b: (b, 0, 0)),
        compiler_params=pltpu.CompilerParams(dimension_semantics=("parallel",)),
    )(x_cf.astype(jnp.float32),
      w0.astype(jnp.float32), b0.reshape(f, 1).astype(jnp.float32),
      w1.astype(jnp.float32), b1.reshape(C, 1).astype(jnp.float32),
      scale.reshape(1, 1).astype(jnp.float32))


def fused_tail(x_p, c1_p, up_p, gate, wf, bf, w4, b4, *, tile):
    """Fused conv_f + add + conv4 + sigmoid + (1+scale*y) gate + multiply."""
    B, C, S = x_p.shape
    f = c1_p.shape[1]
    n_t = S // tile
    return pl.pallas_call(
        _tail_kernel,
        out_shape=jax.ShapeDtypeStruct((B, C, S), jnp.float32),
        grid=(B, n_t),
        in_specs=[
            pl.BlockSpec((1, C, tile), lambda b, t: (b, 0, t)),   # x
            pl.BlockSpec((1, f, tile), lambda b, t: (b, 0, t)),   # c1_
            pl.BlockSpec((1, f, tile), lambda b, t: (b, 0, t)),   # upsampled c3
            pl.BlockSpec((1, C, 1), lambda b, t: (b, 0, 0)),      # std gate
            pl.BlockSpec((f, f), lambda b, t: (0, 0)),            # conv_f w
            pl.BlockSpec((f, 1), lambda b, t: (0, 0)),            # conv_f b
            pl.BlockSpec((C, f), lambda b, t: (0, 0)),            # conv4 w
            pl.BlockSpec((C, 1), lambda b, t: (0, 0)),            # conv4 b
        ],
        out_specs=pl.BlockSpec((1, C, tile), lambda b, t: (b, 0, t)),
        compiler_params=pltpu.CompilerParams(
            dimension_semantics=("parallel", "parallel"),
            vmem_limit_bytes=32 * 1024 * 1024),
    )(x_p, c1_p, up_p, gate,
      wf.astype(jnp.bfloat16), bf.reshape(f, 1).astype(jnp.float32),
      w4.astype(jnp.bfloat16), b4.reshape(C, 1).astype(jnp.float32))


# --------------------------------------------------------------------------- #
# ESAplus forward
# --------------------------------------------------------------------------- #
def esaplus_forward(x, params):
    x = x.astype(jnp.float32)
    B, C, H, W = x.shape
    f = params["conv1_w"].shape[0]
    HW = H * W

    x_cf = x.reshape(B, C, HW)                     # native NCHW, spatial on lanes
    hw_pad = _round_up(HW, 128)
    x_p = (jnp.pad(x_cf, ((0, 0), (0, 0), (0, hw_pad - HW)))
           if hw_pad != HW else x_cf)
    tile = _pick_tile(hw_pad)

    # conv1: 1x1, C -> f  (full resolution, spatial-tiled bf16 matmul)
    c1_p = conv_channels_matmul(x_p, params["conv1_w"].reshape(f, C),
                                params["conv1_b"], out_dtype=jnp.bfloat16)

    # conv2: 3x3, stride 2, no padding
    c1_img = c1_p[:, :, :HW].reshape(B, f, H, W)
    c1s = conv3x3_via_taps(c1_img, params["conv2_w"], params["conv2_b"],
                           stride=2, padding=0)

    # 7x7 / stride-3 max pool
    v_max = maxpool7s3(c1s)

    # conv_max + relu, conv3 + relu, conv3_
    v_range = conv3x3_via_taps(v_max, params["conv_max_w"], params["conv_max_b"],
                               stride=1, padding=1, relu=True)
    c3 = conv3x3_via_taps(v_range, params["conv3_w"], params["conv3_b"],
                          stride=1, padding=1, relu=True)
    c3 = conv3x3_via_taps(c3, params["conv3__w"], params["conv3__b"],
                          stride=1, padding=1)

    # separable bilinear upsample back to (H, W)
    c3_up = bilinear_upsample(c3, H, W)                       # (B, f, H, W) bf16
    up_p = c3_up.reshape(B, f, HW)
    if hw_pad != HW:
        up_p = jnp.pad(up_p, ((0, 0), (0, 0), (0, hw_pad - HW)))

    # std branch gate: 1 + scale * sigmoid(conv(relu(conv(std(x)))))
    gate = std_branch(x_cf, params["sb0_w"].reshape(f, C), params["sb0_b"],
                      params["sb1_w"].reshape(C, f), params["sb1_b"],
                      params["scale"])

    # fused tail: cf = conv_f(c1_); c4 = conv4(c3_up + cf);
    #             out = x * sigmoid(c4) * gate
    out_p = fused_tail(x_p, c1_p, up_p, gate,
                       params["conv_f_w"].reshape(f, f), params["conv_f_b"],
                       params["conv4_w"].reshape(C, f), params["conv4_b"],
                       tile=tile)
    if hw_pad != HW:
        out_p = out_p[:, :, :HW]
    return out_p.reshape(B, C, H, W)


# --------------------------------------------------------------------------- #
# Deterministic parameter init (shapes match the PyTorch __init__)
# --------------------------------------------------------------------------- #
def init_params(key, n_feats, reduction=4):
    f = n_feats // reduction

    def conv_init(k, cout, cin, kh, kw):
        kw_, kb_ = jax.random.split(k)
        bound = 1.0 / jnp.sqrt(cin * kh * kw)
        w = jax.random.uniform(kw_, (cout, cin, kh, kw), jnp.float32, -bound, bound)
        b = jax.random.uniform(kb_, (cout,), jnp.float32, -bound, bound)
        return w, b

    ks = jax.random.split(key, 9)
    p = {}
    p["conv1_w"], p["conv1_b"] = conv_init(ks[0], f, n_feats, 1, 1)
    p["conv_f_w"], p["conv_f_b"] = conv_init(ks[1], f, f, 1, 1)
    p["conv_max_w"], p["conv_max_b"] = conv_init(ks[2], f, f, 3, 3)
    p["conv2_w"], p["conv2_b"] = conv_init(ks[3], f, f, 3, 3)
    p["conv3_w"], p["conv3_b"] = conv_init(ks[4], f, f, 3, 3)
    p["conv3__w"], p["conv3__b"] = conv_init(ks[5], f, f, 3, 3)
    p["conv4_w"], p["conv4_b"] = conv_init(ks[6], n_feats, f, 1, 1)
    p["sb0_w"], p["sb0_b"] = conv_init(ks[7], f, n_feats, 1, 1)
    p["sb1_w"], p["sb1_b"] = conv_init(ks[8], n_feats, f, 1, 1)
    p["scale"] = jnp.array([1.0], jnp.float32)   # Scale(init_value=1.0)
    return p


if __name__ == "__main__":
    key = jax.random.PRNGKey(0)
    k_x, k_p = jax.random.split(key)

    B, C, H, W = 2, 16, 24, 24     # n_feats=16, reduction=4 -> f=4
    x = jax.random.normal(k_x, (B, C, H, W), jnp.float32)
    params = init_params(k_p, n_feats=C, reduction=4)

    out = jax.jit(esaplus_forward)(x, params)
    out = jax.block_until_ready(out)
    assert out.shape == (B, C, H, W)
    assert bool(jnp.all(jnp.isfinite(out)))
    print("KERNEL_OK")
</pallas_src>

<mosaic_0001>
module attributes {stable_mosaic.version = 11 : i64} {
  func.func @_chan_matmul_kernel(%arg0: i32, %arg1: i32, %arg2: memref<1x16x640xf32, #tpu.memory_space<vmem>>, %arg3: memref<4x16xbf16, #tpu.memory_space<vmem>>, %arg4: memref<4x1xf32, #tpu.memory_space<vmem>>, %arg5: memref<1x4x640xbf16, #tpu.memory_space<vmem>>) attributes {dimension_semantics = [#tpu.dimension_semantics<parallel>, #tpu.dimension_semantics<parallel>], iteration_bounds = array<i64: 2, 1>, scalar_prefetch = 0 : i64, scratch_operands = 0 : i64, tpu.core_type = #tpu.core_type<tc>, window_params = [{transform_indices = @transform_0, window_bounds = array<i64: 1, 16, 640>}, {pipeline_mode = #tpu.pipeline_mode<synchronous>, transform_indices = @transform_1, window_bounds = array<i64: 4, 16>}, {pipeline_mode = #tpu.pipeline_mode<synchronous>, transform_indices = @transform_2, window_bounds = array<i64: 4, 1>}, {transform_indices = @transform_3, window_bounds = array<i64: 1, 4, 640>}]} {
    %c0 = arith.constant 0 : index
    %c0_0 = arith.constant 0 : index
    %c0_1 = arith.constant 0 : index
    %0 = vector.load %arg2[%c0, %c0_0, %c0_1] : memref<1x16x640xf32, #tpu.memory_space<vmem>>, vector<1x16x640xf32>
    %1 = vector.shape_cast %0 : vector<1x16x640xf32> to vector<16x640xf32>
    %2 = arith.truncf %1 : vector<16x640xf32> to vector<16x640xbf16>
    %c0_2 = arith.constant 0 : index
    %c0_3 = arith.constant 0 : index
    %3 = vector.load %arg3[%c0_2, %c0_3] : memref<4x16xbf16, #tpu.memory_space<vmem>>, vector<4x16xbf16>
    %cst = arith.constant dense<0.000000e+00> : vector<4x640xf32>
    %4 = tpu.matmul %3, %2, %cst {dimension_numbers = #tpu.dot_dimension_numbers<[1], [0], [0], [1], [0, 0, 1, 1], [], []>} : vector<4x16xbf16>, vector<16x640xbf16>, vector<4x640xf32> -> vector<4x640xf32>
    %c0_4 = arith.constant 0 : index
    %c0_5 = arith.constant 0 : index
    %5 = vector.load %arg4[%c0_4, %c0_5] : memref<4x1xf32, #tpu.memory_space<vmem>>, vector<4x1xf32>
    %6 = vector.broadcast %5 : vector<4x1xf32> to vector<4x640xf32>
    %7 = arith.addf %4, %6 : vector<4x640xf32>
    %8 = arith.truncf %7 : vector<4x640xf32> to vector<4x640xbf16>
    %c0_6 = arith.constant 0 : index
    %c0_7 = arith.constant 0 : index
    %c0_8 = arith.constant 0 : index
    %9 = vector.load %arg5[%c0_6, %c0_7, %c0_8] : memref<1x4x640xbf16, #tpu.memory_space<vmem>>, vector<1x4x640xbf16>
    %10 = vector.shape_cast %9 : vector<1x4x640xbf16> to vector<4x640xbf16>
    %11 = vector.shape_cast %8 : vector<4x640xbf16> to vector<1x4x640xbf16>
    tpu.vector_store %arg5[%c0_6, %c0_7, %c0_8], %11 {strides = array<i32>} : memref<1x4x640xbf16, #tpu.memory_space<vmem>>, vector<1x4x640xbf16>,
    return
  }
  func.func @transform_0(%arg0: i32, %arg1: i32) -> (i32, i32, i32) {
    %c0_i32 = arith.constant 0 : i32
    %c0_i32_0 = arith.constant 0 : i32
    return %arg0, %c0_i32, %arg1 : i32, i32, i32
  }
  func.func @transform_1(%arg0: i32, %arg1: i32) -> (i32, i32) {
    %c0_i32 = arith.constant 0 : i32
    %c0_i32_0 = arith.constant 0 : i32
    %c0_i32_1 = arith.constant 0 : i32
    return %c0_i32, %c0_i32_0 : i32, i32
  }
  func.func @transform_2(%arg0: i32, %arg1: i32) -> (i32, i32) {
    %c0_i32 = arith.constant 0 : i32
    %c0_i32_0 = arith.constant 0 : i32
    %c0_i32_1 = arith.constant 0 : i32
    return %c0_i32, %c0_i32_0 : i32, i32
  }
  func.func @transform_3(%arg0: i32, %arg1: i32) -> (i32, i32, i32) {
    %c0_i32 = arith.constant 0 : i32
    %c0_i32_0 = arith.constant 0 : i32
    return %arg0, %c0_i32, %arg1 : i32, i32, i32
  }
}

module attributes {stable_mosaic.version = 11 : i64} {
  func.func @_std_branch_kernel(%arg0: i32, %arg1: memref<1x16x576xf32, #tpu.memory_space<vmem>>, %arg2: memref<4x16xf32, #tpu.memory_space<vmem>>, %arg3: memref<4x1xf32, #tpu.memory_space<vmem>>, %arg4: memref<16x4xf32, #tpu.memory_space<vmem>>, %arg5: memref<16x1xf32, #tpu.memory_space<vmem>>, %arg6: memref<1x1xf32, #tpu.memory_space<vmem>>, %arg7: memref<1x16x1xf32, #tpu.memory_space<vmem>>) attributes {dimension_semantics = [#tpu.dimension_semantics<parallel>], iteration_bounds = array<i64: 2>, scalar_prefetch = 0 : i64, scratch_operands = 0 : i64, tpu.core_type = #tpu.core_type<tc>, window_params = [{transform_indices = @transform_0, window_bounds = array<i64: 1, 16, 576>}, {pipeline_mode = #tpu.pipeline_mode<synchronous>, transform_indices = @transform_1, window_bounds = array<i64: 4, 16>}, {pipeline_mode = #tpu.pipeline_mode<synchronous>, transform_indices = @transform_2, window_bounds = array<i64: 4, 1>}, {pipeline_mode = #tpu.pipeline_mode<synchronous>, transform_indices = @transform_3, window_bounds = array<i64: 16, 4>}, {pipeline_mode = #tpu.pipeline_mode<synchronous>, transform_indices = @transform_4, window_bounds = array<i64: 16, 1>}, {pipeline_mode = #tpu.pipeline_mode<synchronous>, transform_indices = @transform_5, window_bounds = array<i64: 1, 1>}, {transform_indices = @transform_6, window_bounds = array<i64: 1, 16, 1>}]} {
    %c0 = arith.constant 0 : index
    %c0_0 = arith.constant 0 : index
    %c0_1 = arith.constant 0 : index
    %0 = vector.load %arg1[%c0, %c0_0, %c0_1] : memref<1x16x576xf32, #tpu.memory_space<vmem>>, vector<1x16x576xf32>
    %1 = vector.shape_cast %0 : vector<1x16x576xf32> to vector<16x576xf32>
    %cst = arith.constant dense<0.000000e+00> : vector<16xf32>
    %2 = vector.multi_reduction <add>, %1, %cst [1] : vector<16x576xf32> to vector<16xf32>
    %3 = vector.shape_cast %2 : vector<16xf32> to vector<16x1xf32>
    %cst_2 = arith.constant 0.00173611112 : f32
    %4 = vector.broadcast %cst_2 : f32 to vector<16x1xf32>
    %5 = arith.mulf %3, %4 : vector<16x1xf32>
    %6 = vector.broadcast %5 : vector<16x1xf32> to vector<16x576xf32>
    %7 = arith.subf %1, %6 : vector<16x576xf32>
    %8 = arith.mulf %7, %7 : vector<16x576xf32>
    %cst_3 = arith.constant dense<0.000000e+00> : vector<16xf32>
    %9 = vector.multi_reduction <add>, %8, %cst_3 [1] : vector<16x576xf32> to vector<16xf32>
    %10 = vector.shape_cast %9 : vector<16xf32> to vector<16x1xf32>
    %cst_4 = arith.constant 0.00173611112 : f32
    %11 = vector.broadcast %cst_4 : f32 to vector<16x1xf32>
    %12 = arith.mulf %10, %11 : vector<16x1xf32>
    %13 = math.sqrt %12 : vector<16x1xf32>
    %c0_5 = arith.constant 0 : index
    %c0_6 = arith.constant 0 : index
    %14 = vector.load %arg2[%c0_5, %c0_6] : memref<4x16xf32, #tpu.memory_space<vmem>>, vector<4x16xf32>
    %cst_7 = arith.constant dense<0.000000e+00> : vector<4x1xf32>
    %15 = tpu.matmul %14, %13, %cst_7 {dimension_numbers = #tpu.dot_dimension_numbers<[1], [0], [0], [1], [0, 0, 1, 1], [], []>} : vector<4x16xf32>, vector<16x1xf32>, vector<4x1xf32> -> vector<4x1xf32>
    %c0_8 = arith.constant 0 : index
    %c0_9 = arith.constant 0 : index
    %16 = vector.load %arg3[%c0_8, %c0_9] : memref<4x1xf32, #tpu.memory_space<vmem>>, vector<4x1xf32>
    %17 = arith.addf %15, %16 : vector<4x1xf32>
    %cst_10 = arith.constant 0.000000e+00 : f32
    %18 = vector.broadcast %cst_10 : f32 to vector<4x1xf32>
    %19 = arith.maximumf %17, %18 : vector<4x1xf32>
    %c0_11 = arith.constant 0 : index
    %c0_12 = arith.constant 0 : index
    %20 = vector.load %arg4[%c0_11, %c0_12] : memref<16x4xf32, #tpu.memory_space<vmem>>, vector<16x4xf32>
    %cst_13 = arith.constant dense<0.000000e+00> : vector<16x1xf32>
    %21 = tpu.matmul %20, %19, %cst_13 {dimension_numbers = #tpu.dot_dimension_numbers<[1], [0], [0], [1], [0, 0, 1, 1], [], []>} : vector<16x4xf32>, vector<4x1xf32>, vector<16x1xf32> -> vector<16x1xf32>
    %c0_14 = arith.constant 0 : index
    %c0_15 = arith.constant 0 : index
    %22 = vector.load %arg5[%c0_14, %c0_15] : memref<16x1xf32, #tpu.memory_space<vmem>>, vector<16x1xf32>
    %23 = arith.addf %21, %22 : vector<16x1xf32>
    %24 = arith.negf %23 : vector<16x1xf32>
    %25 = math.exp %24 : vector<16x1xf32>
    %cst_16 = arith.constant 1.000000e+00 : f32
    %26 = vector.broadcast %cst_16 : f32 to vector<16x1xf32>
    %27 = arith.addf %26, %25 : vector<16x1xf32>
    %28 = arith.divf %26, %27 : vector<16x1xf32>
    %c0_17 = arith.constant 0 : index
    %c0_18 = arith.constant 0 : index
    %29 = vector.load %arg6[%c0_17, %c0_18] : memref<1x1xf32, #tpu.memory_space<vmem>>, vector<1x1xf32>
    %30 = vector.broadcast %29 : vector<1x1xf32> to vector<16x1xf32>
    %31 = arith.mulf %30, %28 : vector<16x1xf32>
    %cst_19 = arith.constant 1.000000e+00 : f32
    %32 = vector.broadcast %cst_19 : f32 to vector<16x1xf32>
    %33 = arith.addf %32, %31 : vector<16x1xf32>
    %c0_20 = arith.constant 0 : index
    %c0_21 = arith.constant 0 : index
    %c0_22 = arith.constant 0 : index
    %34 = vector.load %arg7[%c0_20, %c0_21, %c0_22] : memref<1x16x1xf32, #tpu.memory_space<vmem>>, vector<1x16x1xf32>
    %35 = vector.shape_cast %34 : vector<1x16x1xf32> to vector<16x1xf32>
    %36 = vector.shape_cast %33 : vector<16x1xf32> to vector<1x16x1xf32>
    tpu.vector_store %arg7[%c0_20, %c0_21, %c0_22], %36 {strides = array<i32>} : memref<1x16x1xf32, #tpu.memory_space<vmem>>, vector<1x16x1xf32>,
    return
  }
  func.func @transform_0(%arg0: i32) -> (i32, i32, i32) {
    %c0_i32 = arith.constant 0 : i32
    %c0_i32_0 = arith.constant 0 : i32
    %c0_i32_1 = arith.constant 0 : i32
    return %arg0, %c0_i32, %c0_i32_0 : i32, i32, i32
  }
  func.func @transform_1(%arg0: i32) -> (i32, i32) {
    %c0_i32 = arith.constant 0 : i32
    %c0_i32_0 = arith.constant 0 : i32
    %c0_i32_1 = arith.constant 0 : i32
    return %c0_i32, %c0_i32_0 : i32, i32
  }
  func.func @transform_2(%arg0: i32) -> (i32, i32) {
    %c0_i32 = arith.constant 0 : i32
    %c0_i32_0 = arith.constant 0 : i32
    %c0_i32_1 = arith.constant 0 : i32
    return %c0_i32, %c0_i32_0 : i32, i32
  }
  func.func @transform_3(%arg0: i32) -> (i32, i32) {
    %c0_i32 = arith.constant 0 : i32
    %c0_i32_0 = arith.constant 0 : i32
    %c0_i32_1 = arith.constant 0 : i32
    return %c0_i32, %c0_i32_0 : i32, i32
  }
  func.func @transform_4(%arg0: i32) -> (i32, i32) {
    %c0_i32 = arith.constant 0 : i32
    %c0_i32_0 = arith.constant 0 : i32
    %c0_i32_1 = arith.constant 0 : i32
    return %c0_i32, %c0_i32_0 : i32, i32
  }
  func.func @transform_5(%arg0: i32) -> (i32, i32) {
    %c0_i32 = arith.constant 0 : i32
    %c0_i32_0 = arith.constant 0 : i32
    %c0_i32_1 = arith.constant 0 : i32
    return %c0_i32, %c0_i32_0 : i32, i32
  }
  func.func @transform_6(%arg0: i32) -> (i32, i32, i32) {
    %c0_i32 = arith.constant 0 : i32
    %c0_i32_0 = arith.constant 0 : i32
    %c0_i32_1 = arith.constant 0 : i32
    return %arg0, %c0_i32, %c0_i32_0 : i32, i32, i32
  }
}

module attributes {stable_mosaic.version = 11 : i64} {
  func.func @_chan_matmul_kernel(%arg0: i32, %arg1: i32, %arg2: memref<1x36x121xbf16, #tpu.memory_space<vmem>>, %arg3: memref<4x36xbf16, #tpu.memory_space<vmem>>, %arg4: memref<4x1xf32, #tpu.memory_space<vmem>>, %arg5: memref<1x4x121xf32, #tpu.memory_space<vmem>>) attributes {dimension_semantics = [#tpu.dimension_semantics<parallel>, #tpu.dimension_semantics<parallel>], iteration_bounds = array<i64: 2, 1>, scalar_prefetch = 0 : i64, scratch_operands = 0 : i64, tpu.core_type = #tpu.core_type<tc>, window_params = [{transform_indices = @transform_0, window_bounds = array<i64: 1, 36, 121>}, {pipeline_mode = #tpu.pipeline_mode<synchronous>, transform_indices = @transform_1, window_bounds = array<i64: 4, 36>}, {pipeline_mode = #tpu.pipeline_mode<synchronous>, transform_indices = @transform_2, window_bounds = array<i64: 4, 1>}, {transform_indices = @transform_3, window_bounds = array<i64: 1, 4, 121>}]} {
    %c0 = arith.constant 0 : index
    %c0_0 = arith.constant 0 : index
    %c0_1 = arith.constant 0 : index
    %0 = vector.load %arg2[%c0, %c0_0, %c0_1] : memref<1x36x121xbf16, #tpu.memory_space<vmem>>, vector<1x36x121xbf16>
    %1 = vector.shape_cast %0 : vector<1x36x121xbf16> to vector<36x121xbf16>
    %c0_2 = arith.constant 0 : index
    %c0_3 = arith.constant 0 : index
    %2 = vector.load %arg3[%c0_2, %c0_3] : memref<4x36xbf16, #tpu.memory_space<vmem>>, vector<4x36xbf16>
    %cst = arith.constant dense<0.000000e+00> : vector<4x121xf32>
    %3 = tpu.matmul %2, %1, %cst {dimension_numbers = #tpu.dot_dimension_numbers<[1], [0], [0], [1], [0, 0, 1, 1], [], []>} : vector<4x36xbf16>, vector<36x121xbf16>, vector<4x121xf32> -> vector<4x121xf32>
    %c0_4 = arith.constant 0 : index
    %c0_5 = arith.constant 0 : index
    %4 = vector.load %arg4[%c0_4, %c0_5] : memref<4x1xf32, #tpu.memory_space<vmem>>, vector<4x1xf32>
    %5 = vector.broadcast %4 : vector<4x1xf32> to vector<4x121xf32>
    %6 = arith.addf %3, %5 : vector<4x121xf32>
    %c0_6 = arith.constant 0 : index
    %c0_7 = arith.constant 0 : index
    %c0_8 = arith.constant 0 : index
    %7 = vector.load %arg5[%c0_6, %c0_7, %c0_8] : memref<1x4x121xf32, #tpu.memory_space<vmem>>, vector<1x4x121xf32>
    %8 = vector.shape_cast %7 : vector<1x4x121xf32> to vector<4x121xf32>
    %9 = vector.shape_cast %6 : vector<4x121xf32> to vector<1x4x121xf32>
    tpu.vector_store %arg5[%c0_6, %c0_7, %c0_8], %9 {strides = array<i32>} : memref<1x4x121xf32, #tpu.memory_space<vmem>>, vector<1x4x121xf32>,
    return
  }
  func.func @transform_0(%arg0: i32, %arg1: i32) -> (i32, i32, i32) {
    %c0_i32 = arith.constant 0 : i32
    %c0_i32_0 = arith.constant 0 : i32
    return %arg0, %c0_i32, %arg1 : i32, i32, i32
  }
  func.func @transform_1(%arg0: i32, %arg1: i32) -> (i32, i32) {
    %c0_i32 = arith.constant 0 : i32
    %c0_i32_0 = arith.constant 0 : i32
    %c0_i32_1 = arith.constant 0 : i32
    return %c0_i32, %c0_i32_0 : i32, i32
  }
  func.func @transform_2(%arg0: i32, %arg1: i32) -> (i32, i32) {
    %c0_i32 = arith.constant 0 : i32
    %c0_i32_0 = arith.constant 0 : i32
    %c0_i32_1 = arith.constant 0 : i32
    return %c0_i32, %c0_i32_0 : i32, i32
  }
  func.func @transform_3(%arg0: i32, %arg1: i32) -> (i32, i32, i32) {
    %c0_i32 = arith.constant 0 : i32
    %c0_i32_0 = arith.constant 0 : i32
    return %arg0, %c0_i32, %arg1 : i32, i32, i32
  }
}

module attributes {stable_mosaic.version = 11 : i64} {
  func.func @_winmax7_kernel(%arg0: i32, %arg1: memref<1x4x11x11xf32, #tpu.memory_space<vmem>>, %arg2: memref<1x4x5x5xf32, #tpu.memory_space<vmem>>) attributes {dimension_semantics = [#tpu.dimension_semantics<parallel>], iteration_bounds = array<i64: 2>, scalar_prefetch = 0 : i64, scratch_operands = 0 : i64, tpu.core_type = #tpu.core_type<tc>, window_params = [{transform_indices = @transform_0, window_bounds = array<i64: 1, 4, 11, 11>}, {transform_indices = @transform_1, window_bounds = array<i64: 1, 4, 5, 5>}]} {
    %c0 = arith.constant 0 : index
    %c0_0 = arith.constant 0 : index
    %c0_1 = arith.constant 0 : index
    %c0_2 = arith.constant 0 : index
    %0 = vector.load %arg1[%c0, %c0_0, %c0_1, %c0_2] : memref<1x4x11x11xf32, #tpu.memory_space<vmem>>, vector<1x4x11x11xf32>
    %1 = vector.shape_cast %0 : vector<1x4x11x11xf32> to vector<4x11x11xf32>
    %2 = vector.extract_strided_slice %1 {offsets = [0, 0, 0], sizes = [4, 10, 11], strides = [1, 1, 1]} : vector<4x11x11xf32> to vector<4x10x11xf32>
    %3 = vector.extract_strided_slice %1 {offsets = [0, 1, 0], sizes = [4, 10, 11], strides = [1, 1, 1]} : vector<4x11x11xf32> to vector<4x10x11xf32>
    %4 = arith.maximumf %2, %3 : vector<4x10x11xf32>
    %5 = vector.extract_strided_slice %4 {offsets = [0, 0, 0], sizes = [4, 8, 11], strides = [1, 1, 1]} : vector<4x10x11xf32> to vector<4x8x11xf32>
    %6 = vector.extract_strided_slice %4 {offsets = [0, 2, 0], sizes = [4, 8, 11], strides = [1, 1, 1]} : vector<4x10x11xf32> to vector<4x8x11xf32>
    %7 = arith.maximumf %5, %6 : vector<4x8x11xf32>
    %8 = vector.extract_strided_slice %7 {offsets = [0, 0, 0], sizes = [4, 5, 11], strides = [1, 1, 1]} : vector<4x8x11xf32> to vector<4x5x11xf32>
    %9 = vector.extract_strided_slice %7 {offsets = [0, 3, 0], sizes = [4, 5, 11], strides = [1, 1, 1]} : vector<4x8x11xf32> to vector<4x5x11xf32>
    %10 = arith.maximumf %8, %9 : vector<4x5x11xf32>
    %11 = vector.extract_strided_slice %10 {offsets = [0, 0, 0], sizes = [4, 5, 10], strides = [1, 1, 1]} : vector<4x5x11xf32> to vector<4x5x10xf32>
    %12 = vector.extract_strided_slice %10 {offsets = [0, 0, 1], sizes = [4, 5, 10], strides = [1, 1, 1]} : vector<4x5x11xf32> to vector<4x5x10xf32>
    %13 = arith.maximumf %11, %12 : vector<4x5x10xf32>
    %14 = vector.extract_strided_slice %13 {offsets = [0, 0, 0], sizes = [4, 5, 8], strides = [1, 1, 1]} : vector<4x5x10xf32> to vector<4x5x8xf32>
    %15 = vector.extract_strided_slice %13 {offsets = [0, 0, 2], sizes = [4, 5, 8], strides = [1, 1, 1]} : vector<4x5x10xf32> to vector<4x5x8xf32>
    %16 = arith.maximumf %14, %15 : vector<4x5x8xf32>
    %17 = vector.extract_strided_slice %16 {offsets = [0, 0, 0], sizes = [4, 5, 5], strides = [1, 1, 1]} : vector<4x5x8xf32> to vector<4x5x5xf32>
    %18 = vector.extract_strided_slice %16 {offsets = [0, 0, 3], sizes = [4, 5, 5], strides = [1, 1, 1]} : vector<4x5x8xf32> to vector<4x5x5xf32>
    %19 = arith.maximumf %17, %18 : vector<4x5x5xf32>
    %c0_3 = arith.constant 0 : index
    %c0_4 = arith.constant 0 : index
    %c0_5 = arith.constant 0 : index
    %c0_6 = arith.constant 0 : index
    %20 = vector.load %arg2[%c0_3, %c0_4, %c0_5, %c0_6] : memref<1x4x5x5xf32, #tpu.memory_space<vmem>>, vector<1x4x5x5xf32>
    %21 = vector.shape_cast %20 : vector<1x4x5x5xf32> to vector<4x5x5xf32>
    %22 = vector.shape_cast %19 : vector<4x5x5xf32> to vector<1x4x5x5xf32>
    tpu.vector_store %arg2[%c0_3, %c0_4, %c0_5, %c0_6], %22 {strides = array<i32>} : memref<1x4x5x5xf32, #tpu.memory_space<vmem>>, vector<1x4x5x5xf32>,
    return
  }
  func.func @transform_0(%arg0: i32) -> (i32, i32, i32, i32) {
    %c0_i32 = arith.constant 0 : i32
    %c0_i32_0 = arith.constant 0 : i32
    %c0_i32_1 = arith.constant 0 : i32
    %c0_i32_2 = arith.constant 0 : i32
    return %arg0, %c0_i32, %c0_i32_0, %c0_i32_1 : i32, i32, i32, i32
  }
  func.func @transform_1(%arg0: i32) -> (i32, i32, i32, i32) {
    %c0_i32 = arith.constant 0 : i32
    %c0_i32_0 = arith.constant 0 : i32
    %c0_i32_1 = arith.constant 0 : i32
    %c0_i32_2 = arith.constant 0 : i32
    return %arg0, %c0_i32, %c0_i32_0, %c0_i32_1 : i32, i32, i32, i32
  }
}

module attributes {stable_mosaic.version = 11 : i64} {
  func.func @_chan_matmul_kernel(%arg0: i32, %arg1: i32, %arg2: memref<1x36x4xf32, #tpu.memory_space<vmem>>, %arg3: memref<4x36xbf16, #tpu.memory_space<vmem>>, %arg4: memref<4x1xf32, #tpu.memory_space<vmem>>, %arg5: memref<1x4x4xf32, #tpu.memory_space<vmem>>) attributes {dimension_semantics = [#tpu.dimension_semantics<parallel>, #tpu.dimension_semantics<parallel>], iteration_bounds = array<i64: 2, 1>, scalar_prefetch = 0 : i64, scratch_operands = 0 : i64, tpu.core_type = #tpu.core_type<tc>, window_params = [{transform_indices = @transform_0, window_bounds = array<i64: 1, 36, 4>}, {pipeline_mode = #tpu.pipeline_mode<synchronous>, transform_indices = @transform_1, window_bounds = array<i64: 4, 36>}, {pipeline_mode = #tpu.pipeline_mode<synchronous>, transform_indices = @transform_2, window_bounds = array<i64: 4, 1>}, {transform_indices = @transform_3, window_bounds = array<i64: 1, 4, 4>}]} {
    %c0 = arith.constant 0 : index
    %c0_0 = arith.constant 0 : index
    %c0_1 = arith.constant 0 : index
    %0 = vector.load %arg2[%c0, %c0_0, %c0_1] : memref<1x36x4xf32, #tpu.memory_space<vmem>>, vector<1x36x4xf32>
    %1 = vector.shape_cast %0 : vector<1x36x4xf32> to vector<36x4xf32>
    %2 = arith.truncf %1 : vector<36x4xf32> to vector<36x4xbf16>
    %c0_2 = arith.constant 0 : index
    %c0_3 = arith.constant 0 : index
    %3 = vector.load %arg3[%c0_2, %c0_3] : memref<4x36xbf16, #tpu.memory_space<vmem>>, vector<4x36xbf16>
    %cst = arith.constant dense<0.000000e+00> : vector<4x4xf32>
    %4 = tpu.matmul %3, %2, %cst {dimension_numbers = #tpu.dot_dimension_numbers<[1], [0], [0], [1], [0, 0, 1, 1], [], []>} : vector<4x36xbf16>, vector<36x4xbf16>, vector<4x4xf32> -> vector<4x4xf32>
    %c0_4 = arith.constant 0 : index
    %c0_5 = arith.constant 0 : index
    %5 = vector.load %arg4[%c0_4, %c0_5] : memref<4x1xf32, #tpu.memory_space<vmem>>, vector<4x1xf32>
    %6 = vector.broadcast %5 : vector<4x1xf32> to vector<4x4xf32>
    %7 = arith.addf %4, %6 : vector<4x4xf32>
    %cst_6 = arith.constant 0.000000e+00 : f32
    %8 = vector.broadcast %cst_6 : f32 to vector<4x4xf32>
    %9 = arith.maximumf %7, %8 : vector<4x4xf32>
    %c0_7 = arith.constant 0 : index
    %c0_8 = arith.constant 0 : index
    %c0_9 = arith.constant 0 : index
    %10 = vector.load %arg5[%c0_7, %c0_8, %c0_9] : memref<1x4x4xf32, #tpu.memory_space<vmem>>, vector<1x4x4xf32>
    %11 = vector.shape_cast %10 : vector<1x4x4xf32> to vector<4x4xf32>
    %12 = vector.shape_cast %9 : vector<4x4xf32> to vector<1x4x4xf32>
    tpu.vector_store %arg5[%c0_7, %c0_8, %c0_9], %12 {strides = array<i32>} : memref<1x4x4xf32, #tpu.memory_space<vmem>>, vector<1x4x4xf32>,
    return
  }
  func.func @transform_0(%arg0: i32, %arg1: i32) -> (i32, i32, i32) {
    %c0_i32 = arith.constant 0 : i32
    %c0_i32_0 = arith.constant 0 : i32
    return %arg0, %c0_i32, %arg1 : i32, i32, i32
  }
  func.func @transform_1(%arg0: i32, %arg1: i32) -> (i32, i32) {
    %c0_i32 = arith.constant 0 : i32
    %c0_i32_0 = arith.constant 0 : i32
    %c0_i32_1 = arith.constant 0 : i32
    return %c0_i32, %c0_i32_0 : i32, i32
  }
  func.func @transform_2(%arg0: i32, %arg1: i32) -> (i32, i32) {
    %c0_i32 = arith.constant 0 : i32
    %c0_i32_0 = arith.constant 0 : i32
    %c0_i32_1 = arith.constant 0 : i32
    return %c0_i32, %c0_i32_0 : i32, i32
  }
  func.func @transform_3(%arg0: i32, %arg1: i32) -> (i32, i32, i32) {
    %c0_i32 = arith.constant 0 : i32
    %c0_i32_0 = arith.constant 0 : i32
    return %arg0, %c0_i32, %arg1 : i32, i32, i32
  }
}

module attributes {stable_mosaic.version = 11 : i64} {
  func.func @_chan_matmul_kernel(%arg0: i32, %arg1: i32, %arg2: memref<1x36x4xf32, #tpu.memory_space<vmem>>, %arg3: memref<4x36xbf16, #tpu.memory_space<vmem>>, %arg4: memref<4x1xf32, #tpu.memory_space<vmem>>, %arg5: memref<1x4x4xf32, #tpu.memory_space<vmem>>) attributes {dimension_semantics = [#tpu.dimension_semantics<parallel>, #tpu.dimension_semantics<parallel>], iteration_bounds = array<i64: 2, 1>, scalar_prefetch = 0 : i64, scratch_operands = 0 : i64, tpu.core_type = #tpu.core_type<tc>, window_params = [{transform_indices = @transform_0, window_bounds = array<i64: 1, 36, 4>}, {pipeline_mode = #tpu.pipeline_mode<synchronous>, transform_indices = @transform_1, window_bounds = array<i64: 4, 36>}, {pipeline_mode = #tpu.pipeline_mode<synchronous>, transform_indices = @transform_2, window_bounds = array<i64: 4, 1>}, {transform_indices = @transform_3, window_bounds = array<i64: 1, 4, 4>}]} {
    %c0 = arith.constant 0 : index
    %c0_0 = arith.constant 0 : index
    %c0_1 = arith.constant 0 : index
    %0 = vector.load %arg2[%c0, %c0_0, %c0_1] : memref<1x36x4xf32, #tpu.memory_space<vmem>>, vector<1x36x4xf32>
    %1 = vector.shape_cast %0 : vector<1x36x4xf32> to vector<36x4xf32>
    %2 = arith.truncf %1 : vector<36x4xf32> to vector<36x4xbf16>
    %c0_2 = arith.constant 0 : index
    %c0_3 = arith.constant 0 : index
    %3 = vector.load %arg3[%c0_2, %c0_3] : memref<4x36xbf16, #tpu.memory_space<vmem>>, vector<4x36xbf16>
    %cst = arith.constant dense<0.000000e+00> : vector<4x4xf32>
    %4 = tpu.matmul %3, %2, %cst {dimension_numbers = #tpu.dot_dimension_numbers<[1], [0], [0], [1], [0, 0, 1, 1], [], []>} : vector<4x36xbf16>, vector<36x4xbf16>, vector<4x4xf32> -> vector<4x4xf32>
    %c0_4 = arith.constant 0 : index
    %c0_5 = arith.constant 0 : index
    %5 = vector.load %arg4[%c0_4, %c0_5] : memref<4x1xf32, #tpu.memory_space<vmem>>, vector<4x1xf32>
    %6 = vector.broadcast %5 : vector<4x1xf32> to vector<4x4xf32>
    %7 = arith.addf %4, %6 : vector<4x4xf32>
    %c0_6 = arith.constant 0 : index
    %c0_7 = arith.constant 0 : index
    %c0_8 = arith.constant 0 : index
    %8 = vector.load %arg5[%c0_6, %c0_7, %c0_8] : memref<1x4x4xf32, #tpu.memory_space<vmem>>, vector<1x4x4xf32>
    %9 = vector.shape_cast %8 : vector<1x4x4xf32> to vector<4x4xf32>
    %10 = vector.shape_cast %7 : vector<4x4xf32> to vector<1x4x4xf32>
    tpu.vector_store %arg5[%c0_6, %c0_7, %c0_8], %10 {strides = array<i32>} : memref<1x4x4xf32, #tpu.memory_space<vmem>>, vector<1x4x4xf32>,
    return
  }
  func.func @transform_0(%arg0: i32, %arg1: i32) -> (i32, i32, i32) {
    %c0_i32 = arith.constant 0 : i32
    %c0_i32_0 = arith.constant 0 : i32
    return %arg0, %c0_i32, %arg1 : i32, i32, i32
  }
  func.func @transform_1(%arg0: i32, %arg1: i32) -> (i32, i32) {
    %c0_i32 = arith.constant 0 : i32
    %c0_i32_0 = arith.constant 0 : i32
    %c0_i32_1 = arith.constant 0 : i32
    return %c0_i32, %c0_i32_0 : i32, i32
  }
  func.func @transform_2(%arg0: i32, %arg1: i32) -> (i32, i32) {
    %c0_i32 = arith.constant 0 : i32
    %c0_i32_0 = arith.constant 0 : i32
    %c0_i32_1 = arith.constant 0 : i32
    return %c0_i32, %c0_i32_0 : i32, i32
  }
  func.func @transform_3(%arg0: i32, %arg1: i32) -> (i32, i32, i32) {
    %c0_i32 = arith.constant 0 : i32
    %c0_i32_0 = arith.constant 0 : i32
    return %arg0, %c0_i32, %arg1 : i32, i32, i32
  }
}

module attributes {stable_mosaic.version = 11 : i64} {
  func.func @_bilinear_up_kernel(%arg0: i32, %arg1: memref<1x4x2x2xf32, #tpu.memory_space<vmem>>, %arg2: memref<24x2xf32, #tpu.memory_space<vmem>>, %arg3: memref<2x24xf32, #tpu.memory_space<vmem>>, %arg4: memref<1x4x24x24xbf16, #tpu.memory_space<vmem>>) attributes {dimension_semantics = [#tpu.dimension_semantics<parallel>], iteration_bounds = array<i64: 2>, scalar_prefetch = 0 : i64, scratch_operands = 0 : i64, tpu.core_type = #tpu.core_type<tc>, window_params = [{transform_indices = @transform_0, window_bounds = array<i64: 1, 4, 2, 2>}, {pipeline_mode = #tpu.pipeline_mode<synchronous>, transform_indices = @transform_1, window_bounds = array<i64: 24, 2>}, {pipeline_mode = #tpu.pipeline_mode<synchronous>, transform_indices = @transform_2, window_bounds = array<i64: 2, 24>}, {transform_indices = @transform_3, window_bounds = array<i64: 1, 4, 24, 24>}]} {
    %c0 = arith.constant 0 : index
    %c0_0 = arith.constant 0 : index
    %0 = vector.load %arg2[%c0, %c0_0] : memref<24x2xf32, #tpu.memory_space<vmem>>, vector<24x2xf32>
    %c0_1 = arith.constant 0 : index
    %c0_2 = arith.constant 0 : index
    %1 = vector.load %arg3[%c0_1, %c0_2] : memref<2x24xf32, #tpu.memory_space<vmem>>, vector<2x24xf32>
    %c0_3 = arith.constant 0 : index
    %c0_4 = arith.constant 0 : index
    %c0_5 = arith.constant 0 : index
    %c0_6 = arith.constant 0 : index
    %2 = vector.load %arg1[%c0_3, %c0_4, %c0_5, %c0_6] : memref<1x4x2x2xf32, #tpu.memory_space<vmem>>, vector<1x1x2x2xf32>
    %3 = vector.shape_cast %2 : vector<1x1x2x2xf32> to vector<2x2xf32>
    %cst = arith.constant dense<0.000000e+00> : vector<2x24xf32>
    %4 = tpu.matmul %3, %1, %cst {dimension_numbers = #tpu.dot_dimension_numbers<[1], [0], [0], [1], [0, 0, 1, 1], [], []>} : vector<2x2xf32>, vector<2x24xf32>, vector<2x24xf32> -> vector<2x24xf32>
    %cst_7 = arith.constant dense<0.000000e+00> : vector<24x24xf32>
    %5 = tpu.matmul %0, %4, %cst_7 {dimension_numbers = #tpu.dot_dimension_numbers<[1], [0], [0], [1], [0, 0, 1, 1], [], []>} : vector<24x2xf32>, vector<2x24xf32>, vector<24x24xf32> -> vector<24x24xf32>
    %6 = arith.truncf %5 : vector<24x24xf32> to vector<24x24xbf16>
    %c0_8 = arith.constant 0 : index
    %c0_9 = arith.constant 0 : index
    %c0_10 = arith.constant 0 : index
    %c0_11 = arith.constant 0 : index
    %7 = vector.load %arg4[%c0_8, %c0_9, %c0_10, %c0_11] : memref<1x4x24x24xbf16, #tpu.memory_space<vmem>>, vector<1x1x24x24xbf16>
    %8 = vector.shape_cast %7 : vector<1x1x24x24xbf16> to vector<24x24xbf16>
    %9 = vector.shape_cast %6 : vector<24x24xbf16> to vector<1x1x24x24xbf16>
    tpu.vector_store %arg4[%c0_8, %c0_9, %c0_10, %c0_11], %9 {strides = array<i32>} : memref<1x4x24x24xbf16, #tpu.memory_space<vmem>>, vector<1x1x24x24xbf16>,
    %c0_12 = arith.constant 0 : index
    %c1 = arith.constant 1 : index
    %c0_13 = arith.constant 0 : index
    %c0_14 = arith.constant 0 : index
    %10 = vector.load %arg1[%c0_12, %c1, %c0_13, %c0_14] : memref<1x4x2x2xf32, #tpu.memory_space<vmem>>, vector<1x1x2x2xf32>
    %11 = vector.shape_cast %10 : vector<1x1x2x2xf32> to vector<2x2xf32>
    %cst_15 = arith.constant dense<0.000000e+00> : vector<2x24xf32>
    %12 = tpu.matmul %11, %1, %cst_15 {dimension_numbers = #tpu.dot_dimension_numbers<[1], [0], [0], [1], [0, 0, 1, 1], [], []>} : vector<2x2xf32>, vector<2x24xf32>, vector<2x24xf32> -> vector<2x24xf32>
    %cst_16 = arith.constant dense<0.000000e+00> : vector<24x24xf32>
    %13 = tpu.matmul %0, %12, %cst_16 {dimension_numbers = #tpu.dot_dimension_numbers<[1], [0], [0], [1], [0, 0, 1, 1], [], []>} : vector<24x2xf32>, vector<2x24xf32>, vector<24x24xf32> -> vector<24x24xf32>
    %14 = arith.truncf %13 : vector<24x24xf32> to vector<24x24xbf16>
    %c0_17 = arith.constant 0 : index
    %c1_18 = arith.constant 1 : index
    %c0_19 = arith.constant 0 : index
    %c0_20 = arith.constant 0 : index
    %15 = vector.load %arg4[%c0_17, %c1_18, %c0_19, %c0_20] : memref<1x4x24x24xbf16, #tpu.memory_space<vmem>>, vector<1x1x24x24xbf16>
    %16 = vector.shape_cast %15 : vector<1x1x24x24xbf16> to vector<24x24xbf16>
    %17 = vector.shape_cast %14 : vector<24x24xbf16> to vector<1x1x24x24xbf16>
    tpu.vector_store %arg4[%c0_17, %c1_18, %c0_19, %c0_20], %17 {strides = array<i32>} : memref<1x4x24x24xbf16, #tpu.memory_space<vmem>>, vector<1x1x24x24xbf16>,
    %c0_21 = arith.constant 0 : index
    %c2 = arith.constant 2 : index
    %c0_22 = arith.constant 0 : index
    %c0_23 = arith.constant 0 : index
    %18 = vector.load %arg1[%c0_21, %c2, %c0_22, %c0_23] : memref<1x4x2x2xf32, #tpu.memory_space<vmem>>, vector<1x1x2x2xf32>
    %19 = vector.shape_cast %18 : vector<1x1x2x2xf32> to vector<2x2xf32>
    %cst_24 = arith.constant dense<0.000000e+00> : vector<2x24xf32>
    %20 = tpu.matmul %19, %1, %cst_24 {dimension_numbers = #tpu.dot_dimension_numbers<[1], [0], [0], [1], [0, 0, 1, 1], [], []>} : vector<2x2xf32>, vector<2x24xf32>, vector<2x24xf32> -> vector<2x24xf32>
    %cst_25 = arith.constant dense<0.000000e+00> : vector<24x24xf32>
    %21 = tpu.matmul %0, %20, %cst_25 {dimension_numbers = #tpu.dot_dimension_numbers<[1], [0], [0], [1], [0, 0, 1, 1], [], []>} : vector<24x2xf32>, vector<2x24xf32>, vector<24x24xf32> -> vector<24x24xf32>
    %22 = arith.truncf %21 : vector<24x24xf32> to vector<24x24xbf16>
    %c0_26 = arith.constant 0 : index
    %c2_27 = arith.constant 2 : index
    %c0_28 = arith.constant 0 : index
    %c0_29 = arith.constant 0 : index
    %23 = vector.load %arg4[%c0_26, %c2_27, %c0_28, %c0_29] : memref<1x4x24x24xbf16, #tpu.memory_space<vmem>>, vector<1x1x24x24xbf16>
    %24 = vector.shape_cast %23 : vector<1x1x24x24xbf16> to vector<24x24xbf16>
    %25 = vector.shape_cast %22 : vector<24x24xbf16> to vector<1x1x24x24xbf16>
    tpu.vector_store %arg4[%c0_26, %c2_27, %c0_28, %c0_29], %25 {strides = array<i32>} : memref<1x4x24x24xbf16, #tpu.memory_space<vmem>>, vector<1x1x24x24xbf16>,
    %c0_30 = arith.constant 0 : index
    %c3 = arith.constant 3 : index
    %c0_31 = arith.constant 0 : index
    %c0_32 = arith.constant 0 : index
    %26 = vector.load %arg1[%c0_30, %c3, %c0_31, %c0_32] : memref<1x4x2x2xf32, #tpu.memory_space<vmem>>, vector<1x1x2x2xf32>
    %27 = vector.shape_cast %26 : vector<1x1x2x2xf32> to vector<2x2xf32>
    %cst_33 = arith.constant dense<0.000000e+00> : vector<2x24xf32>
    %28 = tpu.matmul %27, %1, %cst_33 {dimension_numbers = #tpu.dot_dimension_numbers<[1], [0], [0], [1], [0, 0, 1, 1], [], []>} : vector<2x2xf32>, vector<2x24xf32>, vector<2x24xf32> -> vector<2x24xf32>
    %cst_34 = arith.constant dense<0.000000e+00> : vector<24x24xf32>
    %29 = tpu.matmul %0, %28, %cst_34 {dimension_numbers = #tpu.dot_dimension_numbers<[1], [0], [0], [1], [0, 0, 1, 1], [], []>} : vector<24x2xf32>, vector<2x24xf32>, vector<24x24xf32> -> vector<24x24xf32>
    %30 = arith.truncf %29 : vector<24x24xf32> to vector<24x24xbf16>
    %c0_35 = arith.constant 0 : index
    %c3_36 = arith.constant 3 : index
    %c0_37 = arith.constant 0 : index
    %c0_38 = arith.constant 0 : index
    %31 = vector.load %arg4[%c0_35, %c3_36, %c0_37, %c0_38] : memref<1x4x24x24xbf16, #tpu.memory_space<vmem>>, vector<1x1x24x24xbf16>
    %32 = vector.shape_cast %31 : vector<1x1x24x24xbf16> to vector<24x24xbf16>
    %33 = vector.shape_cast %30 : vector<24x24xbf16> to vector<1x1x24x24xbf16>
    tpu.vector_store %arg4[%c0_35, %c3_36, %c0_37, %c0_38], %33 {strides = array<i32>} : memref<1x4x24x24xbf16, #tpu.memory_space<vmem>>, vector<1x1x24x24xbf16>,
    return
  }
  func.func @transform_0(%arg0: i32) -> (i32, i32, i32, i32) {
    %c0_i32 = arith.constant 0 : i32
    %c0_i32_0 = arith.constant 0 : i32
    %c0_i32_1 = arith.constant 0 : i32
    %c0_i32_2 = arith.constant 0 : i32
    return %arg0, %c0_i32, %c0_i32_0, %c0_i32_1 : i32, i32, i32, i32
  }
  func.func @transform_1(%arg0: i32) -> (i32, i32) {
    %c0_i32 = arith.constant 0 : i32
    %c0_i32_0 = arith.constant 0 : i32
    %c0_i32_1 = arith.constant 0 : i32
    return %c0_i32, %c0_i32_0 : i32, i32
  }
  func.func @transform_2(%arg0: i32) -> (i32, i32) {
    %c0_i32 = arith.constant 0 : i32
    %c0_i32_0 = arith.constant 0 : i32
    %c0_i32_1 = arith.constant 0 : i32
    return %c0_i32, %c0_i32_0 : i32, i32
  }
  func.func @transform_3(%arg0: i32) -> (i32, i32, i32, i32) {
    %c0_i32 = arith.constant 0 : i32
    %c0_i32_0 = arith.constant 0 : i32
    %c0_i32_1 = arith.constant 0 : i32
    %c0_i32_2 = arith.constant 0 : i32
    return %arg0, %c0_i32, %c0_i32_0, %c0_i32_1 : i32, i32, i32, i32
  }
}

module attributes {stable_mosaic.version = 11 : i64} {
  func.func @_tail_kernel(%arg0: i32, %arg1: i32, %arg2: memref<1x16x640xf32, #tpu.memory_space<vmem>>, %arg3: memref<1x4x640xbf16, #tpu.memory_space<vmem>>, %arg4: memref<1x4x640xbf16, #tpu.memory_space<vmem>>, %arg5: memref<1x16x1xf32, #tpu.memory_space<vmem>>, %arg6: memref<4x4xbf16, #tpu.memory_space<vmem>>, %arg7: memref<4x1xf32, #tpu.memory_space<vmem>>, %arg8: memref<16x4xbf16, #tpu.memory_space<vmem>>, %arg9: memref<16x1xf32, #tpu.memory_space<vmem>>, %arg10: memref<1x16x640xf32, #tpu.memory_space<vmem>>) attributes {dimension_semantics = [#tpu.dimension_semantics<parallel>, #tpu.dimension_semantics<parallel>], iteration_bounds = array<i64: 2, 1>, scalar_prefetch = 0 : i64, scratch_operands = 0 : i64, tpu.core_type = #tpu.core_type<tc>, window_params = [{transform_indices = @transform_0, window_bounds = array<i64: 1, 16, 640>}, {transform_indices = @transform_1, window_bounds = array<i64: 1, 4, 640>}, {transform_indices = @transform_2, window_bounds = array<i64: 1, 4, 640>}, {transform_indices = @transform_3, window_bounds = array<i64: 1, 16, 1>}, {pipeline_mode = #tpu.pipeline_mode<synchronous>, transform_indices = @transform_4, window_bounds = array<i64: 4, 4>}, {pipeline_mode = #tpu.pipeline_mode<synchronous>, transform_indices = @transform_5, window_bounds = array<i64: 4, 1>}, {pipeline_mode = #tpu.pipeline_mode<synchronous>, transform_indices = @transform_6, window_bounds = array<i64: 16, 4>}, {pipeline_mode = #tpu.pipeline_mode<synchronous>, transform_indices = @transform_7, window_bounds = array<i64: 16, 1>}, {transform_indices = @transform_8, window_bounds = array<i64: 1, 16, 640>}]} {
    %c0 = arith.constant 0 : index
    %c0_0 = arith.constant 0 : index
    %c0_1 = arith.constant 0 : index
    %0 = vector.load %arg3[%c0, %c0_0, %c0_1] : memref<1x4x640xbf16, #tpu.memory_space<vmem>>, vector<1x4x640xbf16>
    %1 = vector.shape_cast %0 : vector<1x4x640xbf16> to vector<4x640xbf16>
    %c0_2 = arith.constant 0 : index
    %c0_3 = arith.constant 0 : index
    %2 = vector.load %arg6[%c0_2, %c0_3] : memref<4x4xbf16, #tpu.memory_space<vmem>>, vector<4x4xbf16>
    %cst = arith.constant dense<0.000000e+00> : vector<4x640xf32>
    %3 = tpu.matmul %2, %1, %cst {dimension_numbers = #tpu.dot_dimension_numbers<[1], [0], [0], [1], [0, 0, 1, 1], [], []>} : vector<4x4xbf16>, vector<4x640xbf16>, vector<4x640xf32> -> vector<4x640xf32>
    %c0_4 = arith.constant 0 : index
    %c0_5 = arith.constant 0 : index
    %4 = vector.load %arg7[%c0_4, %c0_5] : memref<4x1xf32, #tpu.memory_space<vmem>>, vector<4x1xf32>
    %5 = vector.broadcast %4 : vector<4x1xf32> to vector<4x640xf32>
    %6 = arith.addf %3, %5 : vector<4x640xf32>
    %c0_6 = arith.constant 0 : index
    %c0_7 = arith.constant 0 : index
    %c0_8 = arith.constant 0 : index
    %7 = vector.load %arg4[%c0_6, %c0_7, %c0_8] : memref<1x4x640xbf16, #tpu.memory_space<vmem>>, vector<1x4x640xbf16>
    %8 = vector.shape_cast %7 : vector<1x4x640xbf16> to vector<4x640xbf16>
    %9 = arith.extf %8 : vector<4x640xbf16> to vector<4x640xf32>
    %10 = arith.addf %9, %6 : vector<4x640xf32>
    %11 = arith.truncf %10 : vector<4x640xf32> to vector<4x640xbf16>
    %c0_9 = arith.constant 0 : index
    %c0_10 = arith.constant 0 : index
    %12 = vector.load %arg8[%c0_9, %c0_10] : memref<16x4xbf16, #tpu.memory_space<vmem>>, vector<16x4xbf16>
    %cst_11 = arith.constant dense<0.000000e+00> : vector<16x640xf32>
    %13 = tpu.matmul %12, %11, %cst_11 {dimension_numbers = #tpu.dot_dimension_numbers<[1], [0], [0], [1], [0, 0, 1, 1], [], []>} : vector<16x4xbf16>, vector<4x640xbf16>, vector<16x640xf32> -> vector<16x640xf32>
    %c0_12 = arith.constant 0 : index
    %c0_13 = arith.constant 0 : index
    %14 = vector.load %arg9[%c0_12, %c0_13] : memref<16x1xf32, #tpu.memory_space<vmem>>, vector<16x1xf32>
    %15 = vector.broadcast %14 : vector<16x1xf32> to vector<16x640xf32>
    %16 = arith.addf %13, %15 : vector<16x640xf32>
    %17 = arith.negf %16 : vector<16x640xf32>
    %18 = math.exp %17 : vector<16x640xf32>
    %cst_14 = arith.constant 1.000000e+00 : f32
    %19 = vector.broadcast %cst_14 : f32 to vector<16x640xf32>
    %20 = arith.addf %19, %18 : vector<16x640xf32>
    %21 = arith.divf %19, %20 : vector<16x640xf32>
    %c0_15 = arith.constant 0 : index
    %c0_16 = arith.constant 0 : index
    %c0_17 = arith.constant 0 : index
    %22 = vector.load %arg2[%c0_15, %c0_16, %c0_17] : memref<1x16x640xf32, #tpu.memory_space<vmem>>, vector<1x16x640xf32>
    %23 = vector.shape_cast %22 : vector<1x16x640xf32> to vector<16x640xf32>
    %24 = arith.mulf %23, %21 : vector<16x640xf32>
    %c0_18 = arith.constant 0 : index
    %c0_19 = arith.constant 0 : index
    %c0_20 = arith.constant 0 : index
    %25 = vector.load %arg5[%c0_18, %c0_19, %c0_20] : memref<1x16x1xf32, #tpu.memory_space<vmem>>, vector<1x16x1xf32>
    %26 = vector.shape_cast %25 : vector<1x16x1xf32> to vector<16x1xf32>
    %27 = vector.broadcast %26 : vector<16x1xf32> to vector<16x640xf32>
    %28 = arith.mulf %24, %27 : vector<16x640xf32>
    %c0_21 = arith.constant 0 : index
    %c0_22 = arith.constant 0 : index
    %c0_23 = arith.constant 0 : index
    %29 = vector.load %arg10[%c0_21, %c0_22, %c0_23] : memref<1x16x640xf32, #tpu.memory_space<vmem>>, vector<1x16x640xf32>
    %30 = vector.shape_cast %29 : vector<1x16x640xf32> to vector<16x640xf32>
    %31 = vector.shape_cast %28 : vector<16x640xf32> to vector<1x16x640xf32>
    tpu.vector_store %arg10[%c0_21, %c0_22, %c0_23], %31 {strides = array<i32>} : memref<1x16x640xf32, #tpu.memory_space<vmem>>, vector<1x16x640xf32>,
    return
  }
  func.func @transform_0(%arg0: i32, %arg1: i32) -> (i32, i32, i32) {
    %c0_i32 = arith.constant 0 : i32
    %c0_i32_0 = arith.constant 0 : i32
    return %arg0, %c0_i32, %arg1 : i32, i32, i32
  }
  func.func @transform_1(%arg0: i32, %arg1: i32) -> (i32, i32, i32) {
    %c0_i32 = arith.constant 0 : i32
    %c0_i32_0 = arith.constant 0 : i32
    return %arg0, %c0_i32, %arg1 : i32, i32, i32
  }
  func.func @transform_2(%arg0: i32, %arg1: i32) -> (i32, i32, i32) {
    %c0_i32 = arith.constant 0 : i32
    %c0_i32_0 = arith.constant 0 : i32
    return %arg0, %c0_i32, %arg1 : i32, i32, i32
  }
  func.func @transform_3(%arg0: i32, %arg1: i32) -> (i32, i32, i32) {
    %c0_i32 = arith.constant 0 : i32
    %c0_i32_0 = arith.constant 0 : i32
    %c0_i32_1 = arith.constant 0 : i32
    return %arg0, %c0_i32, %c0_i32_0 : i32, i32, i32
  }
  func.func @transform_4(%arg0: i32, %arg1: i32) -> (i32, i32) {
    %c0_i32 = arith.constant 0 : i32
    %c0_i32_0 = arith.constant 0 : i32
    %c0_i32_1 = arith.constant 0 : i32
    return %c0_i32, %c0_i32_0 : i32, i32
  }
  func.func @transform_5(%arg0: i32, %arg1: i32) -> (i32, i32) {
    %c0_i32 = arith.constant 0 : i32
    %c0_i32_0 = arith.constant 0 : i32
    %c0_i32_1 = arith.constant 0 : i32
    return %c0_i32, %c0_i32_0 : i32, i32
  }
  func.func @transform_6(%arg0: i32, %arg1: i32) -> (i32, i32) {
    %c0_i32 = arith.constant 0 : i32
    %c0_i32_0 = arith.constant 0 : i32
    %c0_i32_1 = arith.constant 0 : i32
    return %c0_i32, %c0_i32_0 : i32, i32
  }
  func.func @transform_7(%arg0: i32, %arg1: i32) -> (i32, i32) {
    %c0_i32 = arith.constant 0 : i32
    %c0_i32_0 = arith.constant 0 : i32
    %c0_i32_1 = arith.constant 0 : i32
    return %c0_i32, %c0_i32_0 : i32, i32
  }
  func.func @transform_8(%arg0: i32, %arg1: i32) -> (i32, i32, i32) {
    %c0_i32 = arith.constant 0 : i32
    %c0_i32_0 = arith.constant 0 : i32
    return %arg0, %c0_i32, %arg1 : i32, i32, i32
  }
}

</mosaic_0001>

<bundles_post_ra>
// kernel: esaplus_forward.16
= control target key start
LH: loop header
LB: loop body
LE: loop exit
PB: predicated region body
PF: predicated region fallthrough
CT: control target
= control target key end

     0   :  { %s686_s23 = smov 0   ;;  %s729_s0 = inlined_call_operand.vmem [shape: f32[2,16,576], index: 0, kind: input, shape index: {}]   ;;  %s730_s1 = inlined_call_operand.vmem [shape: f32[4,16], index: 1, kind: input, shape index: {}]   ;;  %s731_s2 = inlined_call_operand.vmem [shape: f32[4,1], index: 2, kind: input, shape index: {}]   ;;  %s732_s3 = inlined_call_operand.vmem [shape: f32[16,4], index: 3, kind: input, shape index: {}]   ;;  %s733_s4 = inlined_call_operand.vmem [shape: f32[16,1], index: 4, kind: input, shape index: {}]   ;;  %s734_s5 = inlined_call_operand.<no memory space> [shape: f32[1,1], index: 5, kind: input, shape index: {}]   ;;  %s735_s6 = inlined_call_operand.vmem [shape: f32[2,16,1], index: 6, kind: output, shape index: {}]  }
   0x1   :  { %v11_v0 = vstv %s734_s5 }
   0x2   :  { %12 = vst [vmem:[#allocation2] sm:$0x1] %v11_v0 }
   0x3 LB: > { %s579_s24 = sadd.s32 4294967295, %s644_s23   ;;  %p583_p0 = scmp.ge.s32.totalorder %s644_s23, 1  ;;  %s644_s23 = sphi %s686_s23, %s18_s23  }
   0x4   : > { %p214_p1 = scmp.lt.s32.totalorder %s644_s23, 3 }
   0x6   : > { %p215_p2 = pnand %p583_p0, %p214_p1 }
   0x7   : > { %p244_p3 = scmp.lt.s32.totalorder (!%p215_p2), %s579_s24, 1 }
   0x8   : > { %218 = sbr.rel (%p215_p2) target bundleno = 774 (0x306), region = 44 }
   0xd   : > { %s737_s24 = smov (!%p244_p3, %s579_s24), 1  ;;  %vm267_vm0 = vcmask 523264   ;;  %v646_v55 = vmov 0.0   ;;  %vm647_vm1 = vmmov 0   ;;  %vm333_vm6 = vcmask 130048  }
   0xe   : > { %s615_s5 = smul.u32 80, %s737_s24  ;;  %603 = vmatprep.subr.mxu0 %v646_v55  ;;  %607 = vmatprep.mubr.msk.f32.mxu0 %vm647_vm1, %v646_v55  ;;  %vm412_vm7 = vcmask 31744   ;;  %vm419_vm8 = vcmask 1043456   ;;  %s596_s16 = sshll.u32 %s737_s24, 4  ;;  %vm521_vm9 = vcmask 7168  }
   0xf   : > { %s253_s19 = scalar_lea.vmem %s735_s6, %s596_s16 }
  0x10   : > { %s248_s27 = scalar_lea.vmem %s729_s0, %s615_s5 }
  0x11   : > { %v259_v1 = vld [vmem:[%s248_s27 + $0x28] sm:$0xff]  ;;  %v260_v2 = vld [vmem:[%s248_s27 + $0x30] sm:$0xff]  ;;  %v261_v3 = vld [vmem:[%s248_s27 + $0x38] sm:$0xff] }
  0x12   : > { %v263_v4 = vld [vmem:[%s248_s27 + $0x48] sm:$0xff]  ;;  %v272_v5 = vadd.f32 %v260_v2, %v259_v1  ;;  %v254_v6 = vld [vmem:[%s248_s27] sm:$0xff]  ;;  %v256_v9 = vld [vmem:[%s248_s27 + $0x10] sm:$0xff] }
  0x13   : > { %v262_v7 = vld [vmem:[%s248_s27 + $0x40] sm:$0xff]  ;;  %v255_v8 = vld [vmem:[%s248_s27 + $0x8] sm:$0xff]  ;;  %v275_v13 = vsel %vm267_vm0, %v263_v4, 0.0  ;;  %v257_v14 = vld [vmem:[%s248_s27 + $0x18] sm:$0xff] }
  0x14   : > { %v273_v10 = vadd.f32 %v272_v5, %v261_v3  ;;  %v258_v11 = vld [vmem:[%s248_s27 + $0x20] sm:$0xff]  ;;  %v264_v12 = vadd.f32 %v255_v8, %v254_v6 }
  0x15   : > { %v268_v17 = vsel %vm267_vm0, %v258_v11, 0.0  ;;  %v331_v5 = vld [vmem:[%s730_s1] sm:$0xf] }
  0x16   : > { %v274_v15 = vadd.f32 %v273_v10, %v262_v7  ;;  %v265_v16 = vadd.f32 %v264_v12, %v256_v9 }
  0x18   : > { %v276_v18 = vadd.f32 %v275_v13, %v274_v15  ;;  %v266_v19 = vadd.f32 %v265_v16, %v257_v14  ;;  %v409_v13 = vld [vmem:[%s732_s3 + $0x8] sm:$0xff]  ;;  %v410_v16 = vld [vmem:[%s733_s4] sm:$0xff] }
  0x1a   : > { %277 = vadd.xlane.f32.xlu0 %v276_v18  ;;  %v269_v20 = vadd.f32 %v268_v17, %v266_v19 }
  0x1e   : > { %270 = vadd.xlane.f32.xlu0 %v269_v20 }
  0xa3   : > { %v278_v21 = vpop.xlane.xlu0 %277 }
  0xa4   : > { %v280_v22 = vmul.f32 0.0017361111, %v278_v21 }
  0xa6   : > { %v286_v23 = vsub.f32 %v259_v1, %v280_v22  ;;  %v287_v24 = vsub.f32 %v260_v2, %v280_v22  ;;  %v288_v25 = vsub.f32 %v261_v3, %v280_v22  ;;  %v289_v27 = vsub.f32 %v262_v7, %v280_v22  ;;  %v408_v7 = vld [vmem:[%s732_s3] sm:$0xff] }
  0xa7   : > { %v271_v26 = vpop.xlane.xlu0 %270  ;;  %v290_v28 = vsub.f32 %v263_v4, %v280_v22  ;;  %612 = vmatprep.mubr.msk.f32.mxu1 %vm412_vm7, %v408_v7 }
  0xa8   : > { %v279_v29 = vmul.f32 0.0017361111, %v271_v26  ;;  %v296_v30 = vmul.f32 %v286_v23, %v286_v23  ;;  %v297_v31 = vmul.f32 %v287_v24, %v287_v24  ;;  %v298_v32 = vmul.f32 %v288_v25, %v288_v25  ;;  %v593_v26 = vld [vmem:[#allocation2] ss:$0 sm:$0xff] }
  0xa9   : > { %v299_v37 = vmul.f32 %v289_v27, %v289_v27  ;;  %v300_v38 = vmul.f32 %v290_v28, %v290_v28 }
  0xaa   : > { %v308_v33 = vadd.f32 %v297_v31, %v296_v30  ;;  %v281_v34 = vsub.f32 %v254_v6, %v279_v29  ;;  %v282_v35 = vsub.f32 %v255_v8, %v279_v29  ;;  %v283_v36 = vsub.f32 %v256_v9, %v279_v29  ;;  %v332_v8 = vld [vmem:[%s731_s2] sm:$0xf] }
  0xab   : > { %v285_v39 = vsub.f32 %v258_v11, %v279_v29  ;;  %v284_v41 = vsub.f32 %v257_v14, %v279_v29  ;;  %v311_v47 = vsel %vm267_vm0, %v300_v38, 0.0  ;;  %v411_v14 = vld [vmem:[%s733_s4 + $0x8] sm:$0xff] }
  0xac   : > { %v309_v40 = vadd.f32 %v308_v33, %v298_v32  ;;  %v291_v42 = vmul.f32 %v281_v34, %v281_v34  ;;  %v292_v43 = vmul.f32 %v282_v35, %v282_v35  ;;  %v293_v45 = vmul.f32 %v283_v36, %v283_v36 }
  0xad   : > { %v295_v48 = vmul.f32 %v285_v39, %v285_v39  ;;  %v294_v50 = vmul.f32 %v284_v41, %v284_v41 }
  0xae   : > { %v310_v44 = vadd.f32 %v309_v40, %v299_v37  ;;  %v301_v46 = vadd.f32 %v292_v43, %v291_v42 }
  0xaf   : > { %v304_v53 = vsel %vm267_vm0, %v295_v48, 0.0 }
  0xb0   : > { %v312_v49 = vadd.f32 %v311_v47, %v310_v44  ;;  %v302_v51 = vadd.f32 %v301_v46, %v293_v45 }
  0xb2   : > { %313 = vadd.xlane.f32.xlu1 %v312_v49  ;;  %v303_v52 = vadd.f32 %v302_v51, %v294_v50 }
  0xb4   : > { %v305_v54 = vadd.f32 %v304_v53, %v303_v52 }
  0xb6   : > { %306 = vadd.xlane.f32.xlu1 %v305_v54 }
 0x13b   : > { %v314_v56 = vpop.xlane.xlu1 %313 }
 0x13c   : > { %v316_v57 = vmul.f32 0.0017361111, %v314_v56 }
 0x13e   : > { %626 = vrsqrt.f32 %v316_v57  ;;  %vm326_vm2 = vcmp.eq.f32.partialorder %v316_v57, inf  ;;  %v329_v62 = vand.u32 2147483648, %v316_v57  ;;  %vm328_vm3 = vcmp.eq.f32.partialorder %v316_v57, 0.0 }
 0x13f   : > { %v307_v58 = vpop.xlane.xlu1 %306 }
 0x140   : > { %v315_v59 = vmul.f32 0.0017361111, %v307_v58 }
 0x142   : > { %628 = vrsqrt.f32 %v315_v59  ;;  %vm319_vm4 = vcmp.eq.f32.partialorder %v315_v59, inf  ;;  %v322_v3 = vand.u32 2147483648, %v315_v59  ;;  %vm321_vm5 = vcmp.eq.f32.partialorder %v315_v59, 0.0 }
 0x14b   : > { %v627_v60 = vpop.eup %626 }
 0x14c   : > { %v325_v61 = vmul.f32 %v627_v60, %v316_v57 }
 0x14e   : > { %v327_v63 = vsel %vm326_vm2, %v316_v57, %v325_v61 }
 0x14f   : > { %v629_v0 = vpop.eup %628  ;;  %v330_v1 = vsel %vm328_vm3, %v329_v62, %v327_v63 }
 0x150   : > { %604 = vmatpush3.msra.mxu0 %v330_v1  ;;  %v318_v2 = vmul.f32 %v629_v0, %v315_v59 }
 0x151   : > { %605 = vmatprep.subr.mxu0 %v646_v55 }
 0x152   : > { %v320_v4 = vsel %vm319_vm4, %v315_v59, %v318_v2 }
 0x153   : > { %v323_v6 = vsel %vm321_vm5, %v322_v3, %v320_v4 }
 0x154   : > { %606 = vmatpush3.msra.mxu0 %v323_v6 }
 0x155   : > { %608 = vmatmul.mubr.msk.f32.vlgmr.msra.gmra.mxu0 %vm333_vm6, %v331_v5 }
 0x215   : > { %v403_v9 = vpop.f32.mrf.mxu0 }
 0x216   : > { %v404_v10 = vadd.f32 %v403_v9, %v332_v8 }
 0x217   : > { %v609_v11 = vpop.f32.mrf.mxu0 }
 0x218   : > { %v407_v12 = vmax.f32 %v404_v10, 0.0 }
 0x21a   : > { %610 = vmatprep.subr.msk.mxu1 %vm419_vm8, %v407_v12 }
 0x21b   : > { %611 = vmatpush3.msk.msra.mxu1 %vm419_vm8, %v407_v12 }
 0x21c   : > { %613 = vmatmul.mubr.msk.f32.vlgmr.msra.gmra.mxu1 %vm412_vm7, %v409_v13 }
 0x2dc   : > { %v614_v15 = vpop.f32.mrf.mxu1 }
 0x2dd   : > { %v495_v17 = vadd.f32 %v614_v15, %v411_v14 }
 0x2de   : > { %v489_v18 = vpop.f32.mrf.mxu1 }
 0x2df   : > { %v592_v19 = vmul.f32 -1.442695, %v495_v17  ;;  %v490_v20 = vadd.f32 %v489_v18, %v410_v16 }
 0x2e1   : > { %630 = vpow2.f32 %v592_v19  ;;  %v591_v21 = vmul.f32 -1.442695, %v490_v20 }
 0x2e3   : > { %632 = vpow2.f32 %v591_v21 }
 0x2ee   : > { %v631_v22 = vpop.eup %630 }
 0x2ef   : > { %v505_v23 = vadd.f32 1.0, %v631_v22 }
 0x2f0   : > { %v633_v24 = vpop.eup %632 }
 0x2f1   : > { %634 = vrcp.f32 %v505_v23  ;;  %v504_v25 = vadd.f32 1.0, %v633_v24 }
 0x2f3   : > { %636 = vrcp.f32 %v504_v25 }
 0x2fe   : > { %v635_v27 = vpop.eup %634 }
 0x2ff   : > { %v518_v28 = vmul.f32 %v635_v27, %v593_v26 }
 0x300   : > { %v637_v29 = vpop.eup %636 }
 0x301   : > { %v520_v30 = vadd.f32 1.0, %v518_v28  ;;  %v517_v31 = vmul.f32 %v637_v29, %v593_v26 }
 0x303   : > { %523 = vst.msk [vmem:[%s253_s19 + $0x8] sm:$0xff] %vm521_vm9, %v520_v30  ;;  %v519_v32 = vadd.f32 1.0, %v517_v31 }
 0x305   : > { %522 = vst.msk [vmem:[%s253_s19] sm:$0xff] %vm521_vm9, %v519_v32 }
 0x306 PF: > { %s18_s23 = sadd.s32 1, %s644_s23  }
 0x307   : > { %p15_p4 = scmp.ge.s32.totalorder %s18_s23, 4  }
 0x309   :  { %17 = sbr.rel (!%p15_p4) target bundleno = 3 (0x3), region = 74 }

// kernel: esaplus_forward.9
= control target key start
LH: loop header
LB: loop body
LE: loop exit
PB: predicated region body
PF: predicated region fallthrough
CT: control target
= control target key end

     0   :  { %s586_s12 = smov 0   ;;  %s588_s13 = smov 0   ;;  %s629_s0 = inlined_call_operand.vmem [shape: f32[2,16,640], index: 0, kind: input, shape index: {}]   ;;  %s630_s1 = inlined_call_operand.vmem [shape: bf16[4,16], index: 1, kind: input, shape index: {}]   ;;  %s631_s2 = inlined_call_operand.vmem [shape: f32[4,1], index: 2, kind: input, shape index: {}]   ;;  %s632_s3 = inlined_call_operand.vmem [shape: bf16[2,4,640], index: 3, kind: output, shape index: {}]  }
   0x1   :  { %s590_s14 = smov 0  }
   0x2 LB: > { %s25_s15 = sadd.s32 1, %s556_s13  ;;  %p488_p0 = scmp.ge.s32.totalorder %s560_s14, 1  ;;  %s560_s14 = sphi %s590_s14, %s13_s14   ;;  %s556_s13 = sphi %s588_s13, %s634_s13   ;;  %s552_s12 = sphi %s586_s12, %s633_s12  }
   0x3   : > { %p27_p1 = scmp.ge.s32.totalorder %s25_s15, 2  ;;  %p158_p2 = scmp.lt.s32.totalorder %s560_s14, 3 }
   0x5   : > { %s636_s15 = smov (%p27_p1, %s25_s15), 0  ;;  %p159_p3 = pnand %p488_p0, %p158_p2 }
   0x6   : > { %p191_p4 = scmp.lt.s32.totalorder (!%p159_p3), %s552_s12, 1 }
   0x7   : > { %162 = sbr.rel (%p159_p3) target bundleno = 231 (0xe7), region = 32 }
   0xc   : > { %v562_v0 = vmov 0   ;;  %v227_v1 = vld [vmem:[%s631_s2] sm:$0xf]  ;;  %s638_s12 = smov (!%p191_p4, %s552_s12), 1  ;;  %vm233_vm0 = vcmask 130048   ;;  %v563_v18 = vmov 0.0   ;;  %v374_v21 = vlaneseq }
   0xd   : > { %269 = vmatprep.mubr.bf16.mxu0 %v562_v0  ;;  %310 = vmatprep.mubr.bf16.mxu1 %v562_v0  ;;  %s507_s18 = smul.u32 80, %s638_s12  ;;  %v226_v16 = vld [vmem:[%s630_s1] sm:$0x3]  ;;  %vm564_vm1 = vmmov 0   ;;  %v565_v19 = vmov 1983009808  }
   0xe   : > { %537 = vset.pattern.permute.xlu0 %v562_v0  ;;  %v372_v20 = vunpack.c.l.s4 %v565_v19  ;;  %v375_v23 = vshrl.u32 %v374_v21, 7  ;;  %s508_s24 = smul.u32 10, %s638_s12 }
   0xf   : > { %230 = vperm.xlu0 %537, %v227_v1   ;;  %s198_s21 = scalar_lea.vmem %s629_s0, %s507_s18 }
  0x10   : > { %v212_v2 = vld [vmem:[%s198_s21 + $0x8] sm:$0xff]  ;;  %v217_v3 = vld [vmem:[%s198_s21 + $0x30] sm:$0xff]  ;;  %v214_v4 = vld [vmem:[%s198_s21 + $0x18] sm:$0xff]  ;;  %v373_v22 = vunpack.c.0.s8 %v372_v20  ;;  %s208_s27 = scalar_lea.vmem %s632_s3, %s508_s24 }
  0x11   : > { %v222_v5 = vpack.c.bf16 %v217_v3, %v212_v2  ;;  %v219_v6 = vld [vmem:[%s198_s21 + $0x40] sm:$0xff]  ;;  %v216_v8 = vld [vmem:[%s198_s21 + $0x28] sm:$0xff]  ;;  %v213_v11 = vld [vmem:[%s198_s21 + $0x10] sm:$0xff] }
  0x12   : > { %v211_v7 = vld [vmem:[%s198_s21] sm:$0xff]  ;;  %v224_v9 = vpack.c.bf16 %v219_v6, %v214_v4  ;;  %v218_v12 = vld [vmem:[%s198_s21 + $0x38] sm:$0xff]  ;;  %v220_v15 = vld [vmem:[%s198_s21 + $0x48] sm:$0xff]  ;;  %v376_v31 = vsub.s32 %v373_v22, %v375_v23 }
  0x13   : > { %v221_v10 = vpack.c.bf16 %v216_v8, %v211_v7  ;;  %v215_v13 = vld [vmem:[%s198_s21 + $0x20] sm:$0xff]  ;;  %251 = vmatprep.subr.bf16.mxu0 %v222_v5  ;;  %v223_v14 = vpack.c.bf16 %v218_v12, %v213_v11 }
  0x14   : > { %292 = vmatprep.subr.bf16.mxu1 %v224_v9  ;;  %v225_v17 = vpack.c.bf16 %v220_v15, %v215_v13 }
  0x15   : > { %252 = vmatpush1.bf16.msra.mxu0 %v221_v10  ;;  %293 = vmatpush1.bf16.msra.mxu1 %v223_v14 }
  0x16   : > { %501 = vmatprep.subr.bf16.mxu0 %v563_v18 }
  0x18   : > { %491 = vmatmul.mubr.msk.bf16.vlgmr.msra.gmra.mxu0 %vm233_vm0, %v226_v16  ;;  %492 = vmatmul.mubr.msk.bf16.vlgmr.msra.gmra.mxu1 %vm233_vm0, %v226_v16 }
  0x19   : > { %502 = vmatpush3.bf16.msra.mxu0 %v225_v17  ;;  %503 = vmatprep.mubr.msk.bf16.mxu0 %vm564_vm1, %v563_v18 }
  0x20   : > { %504 = vmatmul.mubr.msk.bf16.vlgmr.msra.gmra.mxu0 %vm233_vm0, %v226_v16 }
  0x8a   : > { %v231_v25 = vpop.permute.xlu0 %230 }
  0xd8   : > { %v271_v24 = vpop.f32.mrf.mxu0  ;;  %v312_v26 = vpop.f32.mrf.mxu1 }
  0xd9   : > { %v313_v28 = vadd.f32 %v312_v26, %v231_v25  ;;  %v272_v29 = vadd.f32 %v271_v24, %v231_v25 }
  0xda   : > { %v273_v27 = vpop.f32.mrf.mxu0  ;;  %v314_v32 = vpop.f32.mrf.mxu1 }
  0xdb   : > { %v274_v30 = vadd.f32 %v273_v27, %v231_v25  ;;  %v315_v33 = vadd.f32 %v314_v32, %v231_v25 }
  0xdc   : > { %v275_v34 = vpop.f32.mrf.mxu0  ;;  %v316_v36 = vpop.f32.mrf.mxu1 }
  0xdd   : > { %v494_v35 = vpack.c.bf16 %v274_v30, %v272_v29  ;;  %v495_v37 = vpack.c.bf16 %v315_v33, %v313_v28 }
  0xde   : > { %v276_v38 = vpop.f32.mrf.mxu0  ;;  %v317_v40 = vpop.f32.mrf.mxu1 }
  0xdf   : > { %v377_v39 = vrot.slane %v494_v35, %v376_v31  ;;  %v384_v41 = vrot.slane %v495_v37, %v376_v31 }
  0xe0   : > { %v353_v42 = vpop.f32.mrf.mxu0 }
  0xe1   : > { %v354_v43 = vadd.f32 %v353_v42, %v231_v25  ;;  %v385_v44 = vcombine.low %v377_v39, %v384_v41 }
  0xe2   : > { %v505_v45 = vpop.f32.mrf.mxu0 }
  0xe3   : > { %v363_v46 = vpack.c.bf16 %v354_v43, %v354_v43  ;;  %395 = vst [vmem:[%s208_s27] sm:$0xff] %v385_v44 }
  0xe4   : > { %v356_v47 = vpop.f32.mrf.mxu0 }
  0xe5   : > { %496 = vst.sshfl [vmem:[%s208_s27 + $0x8] sm:$0x3 pattern:$0x76325410] %v363_v46 }
  0xe6   : > { %v506_v48 = vpop.f32.mrf.mxu0 }
  0xe7 PF: > { %s13_s14 = sadd.s32 1, %s560_s14   ;;  %s633_s12 = smov %s556_s13 }
  0xe8   : > { %p10_p5 = scmp.ge.s32.totalorder %s13_s14, 4   ;;  %s634_s13 = smov %s636_s15 }
  0xea   :  { %12 = sbr.rel (!%p10_p5) target bundleno = 2 (0x2), region = 62 }

// kernel: esaplus_forward.10
= control target key start
LH: loop header
LB: loop body
LE: loop exit
PB: predicated region body
PF: predicated region fallthrough
CT: control target
= control target key end

     0   :  { %s461_s12 = smov 0   ;;  %s463_s13 = smov 0   ;;  %s500_s0 = inlined_call_operand.vmem [shape: bf16[2,36,121], index: 0, kind: input, shape index: {}]   ;;  %s501_s1 = inlined_call_operand.vmem [shape: bf16[4,36], index: 1, kind: input, shape index: {}]   ;;  %s502_s2 = inlined_call_operand.vmem [shape: f32[4,1], index: 2, kind: input, shape index: {}]   ;;  %s503_s3 = inlined_call_operand.vmem [shape: f32[2,4,121], index: 3, kind: output, shape index: {}]  }
   0x1   :  { %s465_s14 = smov 0  }
   0x2 LB: > { %s25_s15 = sadd.s32 1, %s432_s13  ;;  %p359_p0 = scmp.ge.s32.totalorder %s436_s14, 1  ;;  %s436_s14 = sphi %s465_s14, %s13_s14   ;;  %s432_s13 = sphi %s463_s13, %s505_s13   ;;  %s428_s12 = sphi %s461_s12, %s504_s12  }
   0x3   : > { %p27_p1 = scmp.ge.s32.totalorder %s25_s15, 2  ;;  %p156_p2 = scmp.lt.s32.totalorder %s436_s14, 3 }
   0x5   : > { %s507_s15 = smov (%p27_p1, %s25_s15), 0  ;;  %p157_p3 = pnand %p359_p0, %p156_p2 }
   0x6   : > { %p185_p4 = scmp.lt.s32.totalorder (!%p157_p3), %s428_s12, 1 }
   0x7   : > { %160 = sbr.rel (%p157_p3) target bundleno = 228 (0xe4), region = 32 }
   0xc   : > { %v438_v0 = vmov 0.0   ;;  %vm439_vm0 = vmmov 0   ;;  %v207_v1 = vld [vmem:[%s502_s2] sm:$0xf]  ;;  %s509_s12 = smov (!%p185_p4, %s428_s12), 1  ;;  %v440_v2 = vmov 0  }
   0xd   : > { %372 = vmatprep.subr.bf16.mxu0 %v438_v0  ;;  %378 = vmatprep.mubr.msk.bf16.mxu0 %vm439_vm0, %v438_v0  ;;  %s382_s18 = smul.u32 20, %s509_s12  ;;  %vm232_vm1 = vcmask 1041408   ;;  %v206_v7 = vld [vmem:[%s501_s1] sm:$0x3]  ;;  %vm228_vm2 = vcmask 293888   ;;  %s361_s24 = sshll.u32 %s509_s12, 2 }
   0xe   : > { %410 = vset.pattern.permute.xlu0 %v440_v2  ;;  %s199_s27 = scalar_lea.vmem %s503_s3, %s361_s24  ;;  %vm276_vm3 = vcmask 986112  }
   0xf   : > { %210 = vperm.xlu0 %410, %v207_v1   ;;  %s192_s21 = scalar_lea.vmem %s500_s0, %s382_s18 }
  0x10   : > { %v411_v3 = vld [vmem:[%s192_s21 + $0x10] ss:$0 sps:$4 sm:$0x33]   ;;  %v412_v5 = vld [vmem:[%s192_s21 + $0x8] sm:$0xff]   ;;  %v413_v6 = vld [vmem:[%s192_s21] sm:$0xff]  }
  0x11   : > { %v234_v4 = vsel %vm232_vm1, %v411_v3, 0 }
  0x12   : > { %373 = vmatpush3.bf16.msra.mxu0 %v234_v4 }
  0x13   : > { %374 = vmatprep.subr.bf16.mxu0 %v438_v0 }
  0x16   : > { %375 = vmatpush3.bf16.msra.mxu0 %v412_v5 }
  0x17   : > { %376 = vmatprep.subr.bf16.mxu0 %v438_v0 }
  0x1a   : > { %377 = vmatpush3.bf16.msra.mxu0 %v413_v6 }
  0x1d   : > { %379 = vmatmul.mubr.msk.bf16.vlgmr.msra.gmra.mxu0 %vm228_vm2, %v206_v7 }
  0x8a   : > { %v211_v8 = vpop.permute.xlu0 %210 }
  0xdd   : > { %v270_v9 = vpop.f32.mrf.mxu0 }
  0xde   : > { %v271_v10 = vadd.f32 %v270_v9, %v211_v8 }
  0xdf   : > { %v380_v11 = vpop.f32.mrf.mxu0 }
  0xe0   : > { %277 = vst.msk [vmem:[%s199_s27] sm:$0xf] %vm276_vm3, %v271_v10 }
  0xe1   : > { %v273_v12 = vpop.f32.mrf.mxu0 }
  0xe3   : > { %v381_v13 = vpop.f32.mrf.mxu0 }
  0xe4 PF: > { %s13_s14 = sadd.s32 1, %s436_s14   ;;  %s504_s12 = smov %s432_s13 }
  0xe5   : > { %p10_p5 = scmp.ge.s32.totalorder %s13_s14, 4   ;;  %s505_s13 = smov %s507_s15 }
  0xe7   :  { %12 = sbr.rel (!%p10_p5) target bundleno = 2 (0x2), region = 62 }

// kernel: esaplus_forward.11
= control target key start
LH: loop header
LB: loop body
LE: loop exit
PB: predicated region body
PF: predicated region fallthrough
CT: control target
= control target key end

     0   :  { %s372_s6 = smov 0   ;;  %s401_s0 = inlined_call_operand.vmem [shape: f32[2,4,11,11], index: 0, kind: input, shape index: {}]   ;;  %s402_s1 = inlined_call_operand.vmem [shape: f32[2,4,5,5], index: 1, kind: output, shape index: {}]  }
   0x1 LB: > { %s327_s7 = sadd.s32 4294967295, %s357_s6   ;;  %p331_p0 = scmp.ge.s32.totalorder %s357_s6, 1  ;;  %s357_s6 = sphi %s372_s6, %s11_s6  }
   0x2   : > { %p87_p1 = scmp.lt.s32.totalorder %s357_s6, 3 }
   0x4   : > { %p88_p2 = pnand %p331_p0, %p87_p1 }
   0x5   : > { %p107_p3 = scmp.lt.s32.totalorder (!%p88_p2), %s327_s7, 1  ;;  %s359_s12 = smov (!%p88_p2), 127  }
   0x6   : > { %91 = sbr.rel (%p88_p2) target bundleno = 389 (0x185), region = 24  ;;  %s360_s13 = smov (!%p88_p2), 126  }
   0x7   : > { %s361_s14 = smov (!%p88_p2), 125  }
   0xb   : > { %s404_s7 = smov (!%p107_p3, %s327_s7), 1  ;;  %vm133_vm0 = vcmask 1046528   ;;  %vm170_vm1 = vcmask 1045504   ;;  %vm267_vm2 = vcmask 36864  }
   0xc   : > { %s338_s8 = sshll.u32 %s404_s7, 6  ;;  %s339_s15 = sshll.u32 %s404_s7, 5 }
   0xd   : > { %s111_s11 = scalar_lea.vmem %s401_s0, %s338_s8  ;;  %s116_s18 = scalar_lea.vmem %s402_s1, %s339_s15 }
   0xe   : > { %v117_v0 = vld [vmem:[%s111_s11] sm:$0xff]  ;;  %v118_v1 = vld [vmem:[%s111_s11 + $0x8] sm:$0x7]  ;;  %v119_v7 = vld [vmem:[%s111_s11 + $0x10] sm:$0xff] }
   0xf   : > { %v121_v2 = vld [vmem:[%s111_s11 + $0x20] sm:$0xff]  ;;  %v134_v3 = vrot.slane %v117_v0, 1  ;;  %v135_v4 = vrot.slane %v118_v1, 1  ;;  %v122_v5 = vld [vmem:[%s111_s11 + $0x28] sm:$0x7]  ;;  %v137_v10 = vrot.slane %v119_v7, 1 }
  0x10   : > { %v140_v6 = vrot.slane %v121_v2, 1  ;;  %v141_v8 = vrot.slane %v122_v5, 1  ;;  %v120_v9 = vld [vmem:[%s111_s11 + $0x18] sm:$0x7]  ;;  %v123_v11 = vld [vmem:[%s111_s11 + $0x30] sm:$0xff] }
  0x11   : > { %v136_v12 = vsel %vm133_vm0, %v134_v3, %v135_v4  ;;  %v155_v13 = vmax.f32 %v118_v1, %v135_v4  ;;  %v138_v14 = vrot.slane %v120_v9, 1  ;;  %v124_v15 = vld [vmem:[%s111_s11 + $0x38] sm:$0x7]  ;;  %v143_v16 = vrot.slane %v123_v11, 1 }
  0x12   : > { %v154_v17 = vmax.f32 %v117_v0, %v136_v12  ;;  %v142_v18 = vsel %vm133_vm0, %v140_v6, %v141_v8  ;;  %v159_v19 = vmax.f32 %v122_v5, %v141_v8  ;;  %v144_v20 = vrot.slane %v124_v15, 1 }
  0x13   : > { %v172_v21 = vrot.slane %v155_v13, 2  ;;  %v158_v22 = vmax.f32 %v121_v2, %v142_v18  ;;  %v139_v23 = vsel %vm133_vm0, %v137_v10, %v138_v14  ;;  %v157_v24 = vmax.f32 %v120_v9, %v138_v14 }
  0x14   : > { %v171_v25 = vrot.slane %v154_v17, 2  ;;  %v178_v26 = vrot.slane %v159_v19, 2  ;;  %v156_v27 = vmax.f32 %v119_v7, %v139_v23  ;;  %v145_v28 = vsel %vm133_vm0, %v143_v16, %v144_v20 }
  0x15   : > { %v177_v29 = vrot.slane %v158_v22, 2  ;;  %v175_v30 = vrot.slane %v157_v24, 2  ;;  %v160_v31 = vmax.f32 %v123_v11, %v145_v28  ;;  %v161_v32 = vmax.f32 %v124_v15, %v144_v20 }
  0x16   : > { %v173_v33 = vsel %vm170_vm1, %v171_v25, %v172_v21  ;;  %v174_v34 = vrot.slane %v156_v27, 2 }
  0x17   : > { %v187_v35 = vmax.f32 %v154_v17, %v173_v33  ;;  %v179_v36 = vsel %vm170_vm1, %v177_v29, %v178_v26  ;;  %v180_v37 = vrot.slane %v160_v31, 2  ;;  %v181_v38 = vrot.slane %v161_v32, 2 }
  0x18   : > { %v189_v39 = vmax.f32 %v158_v22, %v179_v36  ;;  %v176_v40 = vsel %vm170_vm1, %v174_v34, %v175_v30 }
  0x19   : > { %v195_v41 = vrot.slane %v187_v35, 3  ;;  %v188_v42 = vmax.f32 %v156_v27, %v176_v40  ;;  %v182_v43 = vsel %vm170_vm1, %v180_v37, %v181_v38 }
  0x1a   : > { %v197_v44 = vrot.slane %v189_v39, 3  ;;  %v190_v45 = vmax.f32 %v160_v31, %v182_v43 }
  0x1b   : > { %v203_v46 = vmax.f32 %v187_v35, %v195_v41  ;;  %v196_v47 = vrot.slane %v188_v42, 3 }
  0x1c   : > { %v205_v48 = vmax.f32 %v189_v39, %v197_v44  ;;  %v198_v49 = vrot.slane %v190_v45, 3 }
  0x1d   : > { %211 = vrot.lane.b32.xlu0 %v203_v46, %s359_s12  ;;  %v204_v50 = vmax.f32 %v188_v42, %v196_v47 }
  0x1e   : > { %215 = vrot.lane.b32.xlu1 %v205_v48, %s359_s12  ;;  %v206_v51 = vmax.f32 %v190_v45, %v198_v49 }
  0x21   : > { %213 = vrot.lane.b32.xlu0 %v204_v50, %s359_s12 }
  0x22   : > { %217 = vrot.lane.b32.xlu1 %v206_v51, %s359_s12 }
  0x8f   : > { %v212_v52 = vpop.permute.xlu0 %211 }
  0x90   : > { %v223_v53 = vmax.f32 %v203_v46, %v212_v52  ;;  %v216_v54 = vpop.permute.xlu1 %215 }
  0x91   : > { %v225_v55 = vmax.f32 %v205_v48, %v216_v54 }
  0x92   : > { %231 = vrot.lane.b32.xlu0 %v223_v53, %s360_s13 }
  0x93   : > { %v214_v56 = vpop.permute.xlu0 %213 }
  0x94   : > { %v224_v57 = vmax.f32 %v204_v50, %v214_v56  ;;  %v218_v58 = vpop.permute.xlu1 %217 }
  0x95   : > { %v226_v59 = vmax.f32 %v206_v51, %v218_v58 }
  0x96   : > { %235 = vrot.lane.b32.xlu0 %v225_v55, %s360_s13  ;;  %233 = vrot.lane.b32.xlu1 %v224_v57, %s360_s13 }
  0x9a   : > { %237 = vrot.lane.b32.xlu1 %v226_v59, %s360_s13 }
 0x104   : > { %v232_v60 = vpop.permute.xlu0 %231 }
 0x105   : > { %v243_v61 = vmax.f32 %v223_v53, %v232_v60 }
 0x107   : > { %251 = vrot.lane.b32.xlu0 %v243_v61, %s361_s14 }
 0x108   : > { %v234_v62 = vpop.permute.xlu1 %233  ;;  %v236_v63 = vpop.permute.xlu0 %235 }
 0x109   : > { %v244_v0 = vmax.f32 %v224_v57, %v234_v62  ;;  %v245_v1 = vmax.f32 %v225_v55, %v236_v63 }
 0x10b   : > { %253 = vrot.lane.b32.xlu1 %v244_v0, %s361_s14  ;;  %255 = vrot.lane.b32.xlu0 %v245_v1, %s361_s14 }
 0x10c   : > { %v238_v2 = vpop.permute.xlu1 %237 }
 0x10d   : > { %v246_v3 = vmax.f32 %v226_v59, %v238_v2 }
 0x10f   : > { %257 = vrot.lane.b32.xlu1 %v246_v3, %s361_s14 }
 0x179   : > { %v252_v4 = vpop.permute.xlu0 %251 }
 0x17a   : > { %v263_v5 = vmax.f32 %v243_v61, %v252_v4 }
 0x17c   : > { %268 = vst.msk [vmem:[%s116_s18] sm:$0x1f] %vm267_vm2, %v263_v5 }
 0x17d   : > { %v254_v6 = vpop.permute.xlu1 %253  ;;  %v256_v7 = vpop.permute.xlu0 %255 }
 0x17e   : > { %v264_v8 = vmax.f32 %v244_v0, %v254_v6  ;;  %v265_v9 = vmax.f32 %v245_v1, %v256_v7 }
 0x180   : > { %269 = vst.msk [vmem:[%s116_s18 + $0x8] sm:$0x1f] %vm267_vm2, %v264_v8  ;;  %270 = vst.msk [vmem:[%s116_s18 + $0x10] sm:$0x1f] %vm267_vm2, %v265_v9 }
 0x181   : > { %v258_v10 = vpop.permute.xlu1 %257 }
 0x182   : > { %v266_v11 = vmax.f32 %v246_v3, %v258_v10 }
 0x184   : > { %271 = vst.msk [vmem:[%s116_s18 + $0x18] sm:$0x1f] %vm267_vm2, %v266_v11 }
 0x185 PF: > { %s11_s6 = sadd.s32 1, %s357_s6  }
 0x186   : > { %p8_p4 = scmp.ge.s32.totalorder %s11_s6, 4  }
 0x188   :  { %10 = sbr.rel (!%p8_p4) target bundleno = 1 (0x1), region = 54 }

// kernel: esaplus_forward.12
= control target key start
LH: loop header
LB: loop body
LE: loop exit
PB: predicated region body
PF: predicated region fallthrough
CT: control target
= control target key end

     0   :  { %s444_s12 = smov 0   ;;  %s446_s13 = smov 0   ;;  %s487_s0 = inlined_call_operand.vmem [shape: f32[2,36,4], index: 0, kind: input, shape index: {}]   ;;  %s488_s1 = inlined_call_operand.vmem [shape: bf16[4,36], index: 1, kind: input, shape index: {}]   ;;  %s489_s2 = inlined_call_operand.vmem [shape: f32[4,1], index: 2, kind: input, shape index: {}]   ;;  %s490_s3 = inlined_call_operand.vmem [shape: f32[2,4,4], index: 3, kind: output, shape index: {}]  }
   0x1   :  { %s448_s14 = smov 0  }
   0x2 LB: > { %s25_s15 = sadd.s32 1, %s415_s13  ;;  %p348_p0 = scmp.ge.s32.totalorder %s419_s14, 1  ;;  %s419_s14 = sphi %s448_s14, %s13_s14   ;;  %s415_s13 = sphi %s446_s13, %s492_s13   ;;  %s411_s12 = sphi %s444_s12, %s491_s12  }
   0x3   : > { %p27_p1 = scmp.ge.s32.totalorder %s25_s15, 2  ;;  %p156_p2 = scmp.lt.s32.totalorder %s419_s14, 3 }
   0x5   : > { %s494_s15 = smov (%p27_p1, %s25_s15), 0  ;;  %p157_p3 = pnand %p348_p0, %p156_p2 }
   0x6   : > { %p185_p4 = scmp.lt.s32.totalorder (!%p157_p3), %s411_s12, 1 }
   0x7   : > { %160 = sbr.rel (%p157_p3) target bundleno = 230 (0xe6), region = 32 }
   0xc   : > { %v421_v0 = vmov 0.0   ;;  %vm422_vm0 = vmmov 0   ;;  %v210_v1 = vld [vmem:[%s489_s2] sm:$0xf]  ;;  %s496_s12 = smov (!%p185_p4, %s411_s12), 1  ;;  %v423_v2 = vmov 0  }
   0xd   : > { %358 = vmatprep.subr.bf16.mxu0 %v421_v0  ;;  %364 = vmatprep.mubr.msk.bf16.mxu0 %vm422_vm0, %v421_v0  ;;  %s368_s18 = smul.u32 40, %s496_s12  ;;  %vm220_vm1 = vcmask 1041408   ;;  %v209_v12 = vld [vmem:[%s488_s1] sm:$0x3]  ;;  %vm216_vm2 = vcmask 293888   ;;  %s350_s24 = sshll.u32 %s496_s12, 2 }
   0xe   : > { %396 = vset.pattern.permute.xlu0 %v423_v2  ;;  %s199_s27 = scalar_lea.vmem %s490_s3, %s350_s24  ;;  %vm265_vm3 = vcmask 27648  }
   0xf   : > { %213 = vperm.xlu0 %396, %v210_v1   ;;  %s192_s21 = scalar_lea.vmem %s487_s0, %s368_s18 }
  0x10   : > { %v205_v3 = vld [vmem:[%s192_s21 + $0x20] sm:$0xf]  ;;  %v203_v5 = vld [vmem:[%s192_s21 + $0x10] sm:$0xff]  ;;  %v204_v6 = vld [vmem:[%s192_s21 + $0x18] sm:$0xff] }
  0x11   : > { %v208_v4 = vpack.c.bf16 %v205_v3, %v205_v3  ;;  %v207_v8 = vpack.c.bf16 %v204_v6, %v203_v5  ;;  %v201_v9 = vld [vmem:[%s192_s21] sm:$0xff]  ;;  %v202_v10 = vld [vmem:[%s192_s21 + $0x8] sm:$0xff] }
  0x12   : > { %v206_v11 = vpack.c.bf16 %v202_v10, %v201_v9 }
  0x13   : > { %v222_v7 = vsel %vm220_vm1, %v208_v4, 0 }
  0x14   : > { %359 = vmatpush3.bf16.msra.mxu0 %v222_v7 }
  0x15   : > { %360 = vmatprep.subr.bf16.mxu0 %v421_v0 }
  0x18   : > { %361 = vmatpush3.bf16.msra.mxu0 %v207_v8 }
  0x19   : > { %362 = vmatprep.subr.bf16.mxu0 %v421_v0 }
  0x1c   : > { %363 = vmatpush3.bf16.msra.mxu0 %v206_v11 }
  0x1f   : > { %365 = vmatmul.mubr.msk.bf16.vlgmr.msra.gmra.mxu0 %vm216_vm2, %v209_v12 }
  0x8a   : > { %v214_v13 = vpop.permute.xlu0 %213 }
  0xdf   : > { %v258_v14 = vpop.f32.mrf.mxu0 }
  0xe0   : > { %v259_v15 = vadd.f32 %v258_v14, %v214_v13 }
  0xe1   : > { %v366_v16 = vpop.f32.mrf.mxu0 }
  0xe2   : > { %v264_v17 = vmax.f32 %v259_v15, 0.0 }
  0xe3   : > { %v261_v18 = vpop.f32.mrf.mxu0 }
  0xe4   : > { %266 = vst.msk [vmem:[%s199_s27] sm:$0xf] %vm265_vm3, %v264_v17 }
  0xe5   : > { %v367_v19 = vpop.f32.mrf.mxu0 }
  0xe6 PF: > { %s13_s14 = sadd.s32 1, %s419_s14   ;;  %s491_s12 = smov %s415_s13 }
  0xe7   : > { %p10_p5 = scmp.ge.s32.totalorder %s13_s14, 4   ;;  %s492_s13 = smov %s494_s15 }
  0xe9   :  { %12 = sbr.rel (!%p10_p5) target bundleno = 2 (0x2), region = 62 }

// kernel: esaplus_forward.14
= control target key start
LH: loop header
LB: loop body
LE: loop exit
PB: predicated region body
PF: predicated region fallthrough
CT: control target
= control target key end

     0   :  { %s443_s12 = smov 0   ;;  %s445_s13 = smov 0   ;;  %s482_s0 = inlined_call_operand.vmem [shape: f32[2,36,4], index: 0, kind: input, shape index: {}]   ;;  %s483_s1 = inlined_call_operand.vmem [shape: bf16[4,36], index: 1, kind: input, shape index: {}]   ;;  %s484_s2 = inlined_call_operand.vmem [shape: f32[4,1], index: 2, kind: input, shape index: {}]   ;;  %s485_s3 = inlined_call_operand.vmem [shape: f32[2,4,4], index: 3, kind: output, shape index: {}]  }
   0x1   :  { %s447_s14 = smov 0  }
   0x2 LB: > { %s25_s15 = sadd.s32 1, %s414_s13  ;;  %p347_p0 = scmp.ge.s32.totalorder %s418_s14, 1  ;;  %s418_s14 = sphi %s447_s14, %s13_s14   ;;  %s414_s13 = sphi %s445_s13, %s487_s13   ;;  %s410_s12 = sphi %s443_s12, %s486_s12  }
   0x3   : > { %p27_p1 = scmp.ge.s32.totalorder %s25_s15, 2  ;;  %p156_p2 = scmp.lt.s32.totalorder %s418_s14, 3 }
   0x5   : > { %s489_s15 = smov (%p27_p1, %s25_s15), 0  ;;  %p157_p3 = pnand %p347_p0, %p156_p2 }
   0x6   : > { %p185_p4 = scmp.lt.s32.totalorder (!%p157_p3), %s410_s12, 1 }
   0x7   : > { %160 = sbr.rel (%p157_p3) target bundleno = 230 (0xe6), region = 32 }
   0xc   : > { %v420_v0 = vmov 0.0   ;;  %vm421_vm0 = vmmov 0   ;;  %v210_v1 = vld [vmem:[%s484_s2] sm:$0xf]  ;;  %s491_s12 = smov (!%p185_p4, %s410_s12), 1  ;;  %v422_v2 = vmov 0  }
   0xd   : > { %357 = vmatprep.subr.bf16.mxu0 %v420_v0  ;;  %363 = vmatprep.mubr.msk.bf16.mxu0 %vm421_vm0, %v420_v0  ;;  %s367_s18 = smul.u32 40, %s491_s12  ;;  %vm220_vm1 = vcmask 1041408   ;;  %v209_v12 = vld [vmem:[%s483_s1] sm:$0x3]  ;;  %vm216_vm2 = vcmask 293888   ;;  %s349_s24 = sshll.u32 %s491_s12, 2 }
   0xe   : > { %395 = vset.pattern.permute.xlu0 %v422_v2  ;;  %s199_s27 = scalar_lea.vmem %s485_s3, %s349_s24  ;;  %vm264_vm3 = vcmask 27648  }
   0xf   : > { %213 = vperm.xlu0 %395, %v210_v1   ;;  %s192_s21 = scalar_lea.vmem %s482_s0, %s367_s18 }
  0x10   : > { %v205_v3 = vld [vmem:[%s192_s21 + $0x20] sm:$0xf]  ;;  %v203_v5 = vld [vmem:[%s192_s21 + $0x10] sm:$0xff]  ;;  %v204_v6 = vld [vmem:[%s192_s21 + $0x18] sm:$0xff] }
  0x11   : > { %v208_v4 = vpack.c.bf16 %v205_v3, %v205_v3  ;;  %v207_v8 = vpack.c.bf16 %v204_v6, %v203_v5  ;;  %v201_v9 = vld [vmem:[%s192_s21] sm:$0xff]  ;;  %v202_v10 = vld [vmem:[%s192_s21 + $0x8] sm:$0xff] }
  0x12   : > { %v206_v11 = vpack.c.bf16 %v202_v10, %v201_v9 }
  0x13   : > { %v222_v7 = vsel %vm220_vm1, %v208_v4, 0 }
  0x14   : > { %358 = vmatpush3.bf16.msra.mxu0 %v222_v7 }
  0x15   : > { %359 = vmatprep.subr.bf16.mxu0 %v420_v0 }
  0x18   : > { %360 = vmatpush3.bf16.msra.mxu0 %v207_v8 }
  0x19   : > { %361 = vmatprep.subr.bf16.mxu0 %v420_v0 }
  0x1c   : > { %362 = vmatpush3.bf16.msra.mxu0 %v206_v11 }
  0x1f   : > { %364 = vmatmul.mubr.msk.bf16.vlgmr.msra.gmra.mxu0 %vm216_vm2, %v209_v12 }
  0x8a   : > { %v214_v13 = vpop.permute.xlu0 %213 }
  0xdf   : > { %v258_v14 = vpop.f32.mrf.mxu0 }
  0xe0   : > { %v259_v15 = vadd.f32 %v258_v14, %v214_v13 }
  0xe1   : > { %v365_v16 = vpop.f32.mrf.mxu0 }
  0xe2   : > { %265 = vst.msk [vmem:[%s199_s27] sm:$0xf] %vm264_vm3, %v259_v15 }
  0xe3   : > { %v261_v17 = vpop.f32.mrf.mxu0 }
  0xe5   : > { %v366_v18 = vpop.f32.mrf.mxu0 }
  0xe6 PF: > { %s13_s14 = sadd.s32 1, %s418_s14   ;;  %s486_s12 = smov %s414_s13 }
  0xe7   : > { %p10_p5 = scmp.ge.s32.totalorder %s13_s14, 4   ;;  %s487_s13 = smov %s489_s15 }
  0xe9   :  { %12 = sbr.rel (!%p10_p5) target bundleno = 2 (0x2), region = 62 }

// kernel: esaplus_forward.15
= control target key start
LH: loop header
LB: loop body
LE: loop exit
PB: predicated region body
PF: predicated region fallthrough
CT: control target
= control target key end

     0   :  { %s1143_s12 = smov 0   ;;  %s1278_s0 = inlined_call_operand.vmem [shape: f32[2,4,2,2], index: 0, kind: input, shape index: {}]   ;;  %s1279_s1 = inlined_call_operand.vmem [shape: f32[24,2], index: 1, kind: input, shape index: {}]   ;;  %s1280_s2 = inlined_call_operand.vmem [shape: f32[2,24], index: 2, kind: input, shape index: {}]   ;;  %s1281_s3 = inlined_call_operand.vmem [shape: bf16[2,4,24,24], index: 3, kind: output, shape index: {}]  }
   0x1 LB: > { %s943_s13 = sadd.s32 4294967295, %s1119_s12   ;;  %p947_p0 = scmp.ge.s32.totalorder %s1119_s12, 1  ;;  %s1119_s12 = sphi %s1143_s12, %s13_s12  }
   0x2   : > { %p137_p1 = scmp.lt.s32.totalorder %s1119_s12, 3 }
   0x4   : > { %p138_p2 = pnand %p947_p0, %p137_p1 }
   0x5   : > { %p161_p3 = scmp.lt.s32.totalorder (!%p138_p2), %s943_s13, 1 }
   0x6   : > { %141 = sbr.rel (%p138_p2) target bundleno = 620 (0x26c), region = 32 }
   0xb   : > { %v174_v0 = vld [vmem:[%s1280_s2] sm:$0x3]  ;;  %vm180_vm0 = vcmask 1041408   ;;  %v1121_v1 = vmov 0.0   ;;  %vm1122_vm1 = vmmov 0   ;;  %s1283_s13 = smov (!%p161_p3, %s943_s13), 1 }
   0xc   : > { %1038 = vmatprep.subr.mxu1 %v1121_v1  ;;  %1054 = vmatprep.subr.mxu0 %v1121_v1  ;;  %s1001_s16 = sshll.u32 %s1283_s13, 3  ;;  %vm176_vm2 = vcmask 15360   ;;  %v1183_v4 = vld [vmem:[%s1279_s1] sm:$0xff]  ;;  %v172_v9 = vld [vmem:[%s1279_s1 + $0x8] sm:$0xff]  ;;  %v173_v10 = vld [vmem:[%s1279_s1 + $0x10] sm:$0xff]  ;;  %s1102_s26 = smul.u32 48, %s1283_s13 }
   0xd   : > { %1039 = vmatpush3.msk.msra.mxu1 %vm180_vm0, %v174_v0  ;;  %1040 = vmatprep.mubr.msk.f32.mxu1 %vm1122_vm1, %v1121_v1  ;;  %s1170_s19 = scalar_lea.vmem %s1278_s0, %s1001_s16  ;;  %vm359_vm3 = vcmask 191488  }
   0xe   : > { %1055 = vmatpush3.msk.msra.mxu0 %vm180_vm0, %v174_v0  ;;  %1056 = vmatprep.mubr.msk.f32.mxu0 %vm1122_vm1, %v1121_v1  ;;  %v175_v2 = vld [vmem:[%s1170_s19] sm:$0x3]  ;;  %v960_v3 = vld [vmem:[%s1170_s19 + $0x2] sm:$0x3]  ;;  %v973_v11 = vld [vmem:[%s1170_s19 + $0x4] sm:$0x3]  ;;  %s1231_s29 = scalar_lea.vmem %s1281_s3, %s1102_s26 }
   0xf   : > { %1043 = vmatprep.subr.mxu1 %v1121_v1  ;;  %1059 = vmatprep.subr.mxu0 %v1121_v1  ;;  %v986_v12 = vld [vmem:[%s1170_s19 + $0x6] sm:$0x3] }
  0x10   : > { %1041 = vmatmul.mubr.msk.f32.vlgmr.msra.gmra.mxu1 %vm176_vm2, %v175_v2  ;;  %1057 = vmatmul.mubr.msk.f32.vlgmr.msra.gmra.mxu0 %vm176_vm2, %v960_v3 }
  0x11   : > { %1045 = vmatprep.mubr.msk.f32.mxu1 %vm1122_vm1, %v1121_v1  ;;  %1061 = vmatprep.mubr.msk.f32.mxu0 %vm1122_vm1, %v1121_v1 }
  0xd0   : > { %v250_v5 = vpop.f32.mrf.mxu1  ;;  %v434_v6 = vpop.f32.mrf.mxu0 }
  0xd1   : > { %1044 = vmatpush3.msk.msra.mxu1 %vm180_vm0, %v250_v5  ;;  %1060 = vmatpush3.msk.msra.mxu0 %vm180_vm0, %v434_v6 }
  0xd2   : > { %v1042_v7 = vpop.f32.mrf.mxu1  ;;  %1046 = vmatmul.mubr.msk.f32.vlgmr.msra.gmra.mxu1 %vm176_vm2, %v1183_v4  ;;  %v1058_v8 = vpop.f32.mrf.mxu0  ;;  %1062 = vmatmul.mubr.msk.f32.vlgmr.msra.gmra.mxu0 %vm176_vm2, %v1183_v4 }
  0xd3   : > { %1070 = vmatprep.subr.mxu1 %v1121_v1  ;;  %1086 = vmatprep.subr.mxu0 %v1121_v1 }
  0xd4   : > { %1048 = vmatprep.mubr.msk.f32.mxu1 %vm1122_vm1, %v1121_v1  ;;  %1064 = vmatprep.mubr.msk.f32.mxu0 %vm1122_vm1, %v1121_v1 }
  0xd5   : > { %1071 = vmatpush3.msk.msra.mxu1 %vm180_vm0, %v174_v0  ;;  %1087 = vmatpush3.msk.msra.mxu0 %vm180_vm0, %v174_v0 }
  0xd6   : > { %1049 = vmatmul.mubr.msk.f32.gmra.mxu1 %vm176_vm2, %v172_v9  ;;  %1065 = vmatmul.mubr.msk.f32.gmra.mxu0 %vm176_vm2, %v172_v9 }
  0xd7   : > { %1051 = vmatprep.mubr.msk.f32.mxu1 %vm1122_vm1, %v1121_v1  ;;  %1067 = vmatprep.mubr.msk.f32.mxu0 %vm1122_vm1, %v1121_v1 }
  0xd8   : > { %1075 = vmatprep.subr.mxu1 %v1121_v1  ;;  %1091 = vmatprep.subr.mxu0 %v1121_v1 }
  0xda   : > { %1052 = vmatmul.mubr.msk.f32.gmra.mxu1 %vm176_vm2, %v173_v10  ;;  %1068 = vmatmul.mubr.msk.f32.gmra.mxu0 %vm176_vm2, %v173_v10 }
  0xdb   : > { %1072 = vmatprep.mubr.msk.f32.mxu1 %vm1122_vm1, %v1121_v1  ;;  %1088 = vmatprep.mubr.msk.f32.mxu0 %vm1122_vm1, %v1121_v1 }
  0xde   : > { %1073 = vmatmul.mubr.msk.f32.vlgmr.msra.gmra.mxu1 %vm176_vm2, %v973_v11  ;;  %1089 = vmatmul.mubr.msk.f32.vlgmr.msra.gmra.mxu0 %vm176_vm2, %v986_v12 }
  0xdf   : > { %1077 = vmatprep.mubr.msk.f32.mxu1 %vm1122_vm1, %v1121_v1  ;;  %1093 = vmatprep.mubr.msk.f32.mxu0 %vm1122_vm1, %v1121_v1 }
 0x192   : > { %v332_v13 = vpop.f32.mrf.mxu1  ;;  %v507_v14 = vpop.f32.mrf.mxu0 }
 0x193   : > { %v1002_v15 = vpack.c.bf16 %v332_v13, %v332_v13  ;;  %v1005_v16 = vpack.c.bf16 %v507_v14, %v507_v14 }
 0x194   : > { %v1047_v17 = vpop.f32.mrf.mxu1  ;;  %v1063_v18 = vpop.f32.mrf.mxu0 }
 0x195   : > { %360 = vst.msk [vmem:[%s1231_s29] sm:$0xf] %vm359_vm3, %v1002_v15  ;;  %970 = vst.msk [vmem:[%s1231_s29 + $0xc] sm:$0xf] %vm359_vm3, %v1005_v16 }
 0x196   : > { %v337_v19 = vpop.f32.mrf.mxu1  ;;  %v512_v20 = vpop.f32.mrf.mxu0 }
 0x197   : > { %v1003_v21 = vpack.c.bf16 %v337_v19, %v337_v19  ;;  %v1006_v22 = vpack.c.bf16 %v512_v20, %v512_v20 }
 0x198   : > { %v1050_v23 = vpop.f32.mrf.mxu1  ;;  %v1066_v24 = vpop.f32.mrf.mxu0 }
 0x199   : > { %361 = vst.msk [vmem:[%s1231_s29 + $0x4] sm:$0xf] %vm359_vm3, %v1003_v21  ;;  %971 = vst.msk [vmem:[%s1231_s29 + $0x10] sm:$0xf] %vm359_vm3, %v1006_v22 }
 0x19a   : > { %v342_v25 = vpop.f32.mrf.mxu1  ;;  %v517_v26 = vpop.f32.mrf.mxu0 }
 0x19b   : > { %v1004_v27 = vpack.c.bf16 %v342_v25, %v342_v25  ;;  %v1007_v28 = vpack.c.bf16 %v517_v26, %v517_v26 }
 0x19c   : > { %v1053_v29 = vpop.f32.mrf.mxu1  ;;  %v1069_v30 = vpop.f32.mrf.mxu0 }
 0x19d   : > { %362 = vst.msk [vmem:[%s1231_s29 + $0x8] sm:$0xf] %vm359_vm3, %v1004_v27  ;;  %972 = vst.msk [vmem:[%s1231_s29 + $0x14] sm:$0xf] %vm359_vm3, %v1007_v28 }
 0x19e   : > { %v609_v31 = vpop.f32.mrf.mxu1  ;;  %v784_v32 = vpop.f32.mrf.mxu0 }
 0x19f   : > { %1076 = vmatpush3.msk.msra.mxu1 %vm180_vm0, %v609_v31  ;;  %1092 = vmatpush3.msk.msra.mxu0 %vm180_vm0, %v784_v32 }
 0x1a0   : > { %v1074_v33 = vpop.f32.mrf.mxu1  ;;  %v1090_v34 = vpop.f32.mrf.mxu0  ;;  %1078 = vmatmul.mubr.msk.f32.vlgmr.msra.gmra.mxu1 %vm176_vm2, %v1183_v4  ;;  %1094 = vmatmul.mubr.msk.f32.vlgmr.msra.gmra.mxu0 %vm176_vm2, %v1183_v4 }
 0x1a1   : > { %1080 = vmatprep.mubr.msk.f32.mxu1 %vm1122_vm1, %v1121_v1  ;;  %1096 = vmatprep.mubr.msk.f32.mxu0 %vm1122_vm1, %v1121_v1 }
 0x1a4   : > { %1081 = vmatmul.mubr.msk.f32.gmra.mxu1 %vm176_vm2, %v172_v9  ;;  %1097 = vmatmul.mubr.msk.f32.gmra.mxu0 %vm176_vm2, %v172_v9 }
 0x1a5   : > { %1083 = vmatprep.mubr.msk.f32.mxu1 %vm1122_vm1, %v1121_v1  ;;  %1099 = vmatprep.mubr.msk.f32.mxu0 %vm1122_vm1, %v1121_v1 }
 0x1a8   : > { %1084 = vmatmul.mubr.msk.f32.gmra.mxu1 %vm176_vm2, %v173_v10  ;;  %1100 = vmatmul.mubr.msk.f32.gmra.mxu0 %vm176_vm2, %v173_v10 }
 0x260   : > { %v682_v35 = vpop.f32.mrf.mxu1  ;;  %v857_v36 = vpop.f32.mrf.mxu0 }
 0x261   : > { %v1008_v37 = vpack.c.bf16 %v682_v35, %v682_v35  ;;  %v1011_v38 = vpack.c.bf16 %v857_v36, %v857_v36 }
 0x262   : > { %v1079_v39 = vpop.f32.mrf.mxu1  ;;  %v1095_v40 = vpop.f32.mrf.mxu0 }
 0x263   : > { %983 = vst.msk [vmem:[%s1231_s29 + $0x18] sm:$0xf] %vm359_vm3, %v1008_v37  ;;  %996 = vst.msk [vmem:[%s1231_s29 + $0x24] sm:$0xf] %vm359_vm3, %v1011_v38 }
 0x264   : > { %v687_v41 = vpop.f32.mrf.mxu1  ;;  %v862_v42 = vpop.f32.mrf.mxu0 }
 0x265   : > { %v1009_v43 = vpack.c.bf16 %v687_v41, %v687_v41  ;;  %v1012_v44 = vpack.c.bf16 %v862_v42, %v862_v42 }
 0x266   : > { %v1082_v45 = vpop.f32.mrf.mxu1  ;;  %v1098_v46 = vpop.f32.mrf.mxu0 }
 0x267   : > { %984 = vst.msk [vmem:[%s1231_s29 + $0x1c] sm:$0xf] %vm359_vm3, %v1009_v43  ;;  %997 = vst.msk [vmem:[%s1231_s29 + $0x28] sm:$0xf] %vm359_vm3, %v1012_v44 }
 0x268   : > { %v692_v47 = vpop.f32.mrf.mxu1  ;;  %v867_v48 = vpop.f32.mrf.mxu0 }
 0x269   : > { %v1010_v49 = vpack.c.bf16 %v692_v47, %v692_v47  ;;  %v1013_v50 = vpack.c.bf16 %v867_v48, %v867_v48 }
 0x26a   : > { %v1085_v51 = vpop.f32.mrf.mxu1  ;;  %v1101_v52 = vpop.f32.mrf.mxu0 }
 0x26b   : > { %985 = vst.msk [vmem:[%s1231_s29 + $0x20] sm:$0xf] %vm359_vm3, %v1010_v49  ;;  %998 = vst.msk [vmem:[%s1231_s29 + $0x2c] sm:$0xf] %vm359_vm3, %v1013_v50 }
 0x26c PF: > { %s13_s12 = sadd.s32 1, %s1119_s12  }
 0x26d   : > { %p10_p4 = scmp.ge.s32.totalorder %s13_s12, 4  }
 0x26f   :  { %12 = sbr.rel (!%p10_p4) target bundleno = 1 (0x1), region = 68 }

// kernel: esaplus_forward.17
= control target key start
LH: loop header
LB: loop body
LE: loop exit
PB: predicated region body
PF: predicated region fallthrough
CT: control target
= control target key end

     0   :  { %s1252_s27 = smov 0   ;;  %s1254_s28 = smov 0   ;;  %s1368_s0 = inlined_call_operand.vmem [shape: f32[2,16,640], index: 0, kind: input, shape index: {}]   ;;  %s1369_s1 = inlined_call_operand.vmem [shape: bf16[2,4,640], index: 1, kind: input, shape index: {}]   ;;  %s1370_s2 = inlined_call_operand.vmem [shape: bf16[2,4,640], index: 2, kind: input, shape index: {}]   ;;  %s1371_s3 = inlined_call_operand.vmem [shape: f32[2,16,1], index: 3, kind: input, shape index: {}]   ;;  %s1372_s4 = inlined_call_operand.vmem [shape: bf16[4,4], index: 4, kind: input, shape index: {}]   ;;  %s1373_s5 = inlined_call_operand.vmem [shape: f32[4,1], index: 5, kind: input, shape index: {}]   ;;  %s1374_s6 = inlined_call_operand.vmem [shape: bf16[16,4], index: 6, kind: input, shape index: {}]   ;;  %s1375_s7 = inlined_call_operand.vmem [shape: f32[16,1], index: 7, kind: input, shape index: {}]   ;;  %s1376_s8 = inlined_call_operand.vmem [shape: f32[2,16,640], index: 8, kind: output, shape index: {}]  }
   0x1   :  { %s1256_s29 = smov 0  }
   0x2 LB: > { %s30_s30 = sadd.s32 1, %s1197_s28  ;;  %p1057_p0 = scmp.ge.s32.totalorder %s1201_s29, 1  ;;  %s1201_s29 = sphi %s1256_s29, %s18_s29   ;;  %s1197_s28 = sphi %s1254_s28, %s1378_s28   ;;  %s1193_s27 = sphi %s1252_s27, %s1377_s27  }
   0x3   : > { %p32_p1 = scmp.ge.s32.totalorder %s30_s30, 2  ;;  %p327_p2 = scmp.lt.s32.totalorder %s1201_s29, 3 }
   0x5   : > { %s1380_s30 = smov (%p32_p1, %s30_s30), 0  ;;  %p328_p3 = pnand %p1057_p0, %p327_p2 }
   0x6   : > { %p393_p4 = scmp.lt.s32.totalorder (!%p328_p3), %s1193_s27, 1 }
   0x7   : > { %331 = sbr.rel (%p328_p3) target bundleno = 480 (0x1e0), region = 52 }
   0xc   : > { %v453_v0 = vlaneseq  ;;  %v1203_v1 = vmov 1983009808   ;;  %v1204_v3 = vmov 0   ;;  %s1382_s27 = smov (!%p393_p4, %s1193_s27), 1  ;;  %v441_v5 = vld [vmem:[%s1373_s5] sm:$0xf] }
   0xd   : > { %v451_v2 = vunpack.c.l.s4 %v1203_v1  ;;  %525 = vmatprep.mubr.bf16.mxu0 %v1204_v3  ;;  %566 = vmatprep.mubr.bf16.mxu1 %v1204_v3  ;;  %v644_v7 = vld [vmem:[%s1375_s7] sm:$0xff]  ;;  %s1088_s13 = sshll.u32 %s1382_s27, 4  ;;  %s1106_s14 = smul.u32 10, %s1382_s27  ;;  %vm477_vm0 = vcmask 1041408   ;;  %vm473_vm1 = vcmask 31744   ;;  %v1205_v20 = vmov 0.0  }
   0xe   : > { %v454_v4 = vshrl.u32 %v453_v0, 7  ;;  %1135 = vset.pattern.permute.xlu0 %v1204_v3  ;;  %1136 = vset.pattern.permute.xlu1 %v1204_v3  ;;  %s1283_s17 = scalar_lea.vmem %s1371_s3, %s1088_s13  ;;  %v440_v19 = vld [vmem:[%s1372_s4] sm:$0x3]  ;;  %vm1206_vm2 = vmmov 0   ;;  %v645_v22 = vld [vmem:[%s1375_s7 + $0x8] sm:$0xff]  ;;  %s1105_s12 = smul.u32 80, %s1382_s27 }
   0xf   : > { %v452_v6 = vunpack.c.0.s8 %v451_v2  ;;  %444 = vperm.xlu0 %1135, %v441_v5   ;;  %s410_s20 = scalar_lea.vmem %s1369_s1, %s1106_s14  ;;  %v887_v10 = vld [vmem:[%s1283_s17 + $0x8] sm:$0xff]  ;;  %653 = vperm.xlu1 %1136, %v645_v22   ;;  %v886_v23 = vld [vmem:[%s1283_s17] sm:$0xff]  ;;  %s420_s9 = scalar_lea.vmem %s1370_s2, %s1106_s14 }
  0x10   : > { %v438_v9 = vld [vmem:[%s410_s20] sm:$0xff]  ;;  %v1064_v16 = vld.sshfl [vmem:[%s410_s20 + $0x8] sm:$0x3 pattern:$0x76325410]  ;;  %s1332_s15 = scalar_lea.vmem %s1368_s0, %s1105_s12  ;;  %s1340_s17 = scalar_lea.vmem %s1376_s8, %s1105_s12 }
  0x11   : > { %v455_v8 = vsub.s32 %v452_v6, %v454_v4  ;;  %v449_v12 = vcombine.high %v438_v9, %v438_v9  ;;  %v491_v21 = vsel %vm477_vm0, %v1064_v16, 0  ;;  %v615_v25 = vld [vmem:[%s420_s9] sm:$0xff]  ;;  %v616_v34 = vld [vmem:[%s420_s9 + $0x8] sm:$0x3] }
  0x12   : > { %v617_v31 = vunpack.c.l.bf16 %v615_v25  ;;  %v618_v38 = vunpack.c.h.bf16 %v615_v25  ;;  %v619_v43 = vunpack.c.l.bf16 %v616_v34  ;;  %v1138_v59 = vld [vmem:[%s1374_s6] sm:$0xff]  }
  0x13   : > { %648 = vperm.xlu0 %1135, %v644_v7   ;;  %v456_v11 = vrot.slane %v438_v9, %v455_v8  ;;  %v463_v15 = vrot.slane %v449_v12, %v455_v8  ;;  %890 = vperm.xlu1 %1136, %v886_v23  }
  0x15   : > { %v464_v13 = vcombine.high %v456_v11, %v456_v11  ;;  %v479_v14 = vsel %vm477_vm0, %v456_v11, 0  ;;  %v465_v17 = vcombine.high %v463_v15, %v463_v15  ;;  %v485_v18 = vsel %vm477_vm0, %v463_v15, 0 }
  0x17   : > { %895 = vperm.xlu0 %1135, %v887_v10   ;;  %1065 = vmatprep.subr.msk.bf16.mxu0 %vm477_vm0, %v464_v13 }
  0x18   : > { %508 = vmatpush1.bf16.msra.mxu0 %v479_v14  ;;  %1067 = vmatprep.subr.msk.bf16.mxu1 %vm477_vm0, %v465_v17 }
  0x19   : > { %1093 = vmatprep.subr.bf16.mxu0 %v1205_v20  ;;  %549 = vmatpush1.bf16.msra.mxu1 %v485_v18 }
  0x1b   : > { %1066 = vmatmul.mubr.msk.bf16.vlgmr.msra.gmra.mxu0 %vm473_vm1, %v440_v19 }
  0x1c   : > { %1094 = vmatpush3.bf16.msra.mxu0 %v491_v21  ;;  %1095 = vmatprep.mubr.msk.bf16.mxu0 %vm1206_vm2, %v1205_v20 }
  0x1d   : > { %1068 = vmatmul.mubr.msk.bf16.vlgmr.msra.gmra.mxu1 %vm473_vm1, %v440_v19 }
  0x1e   : > { %711 = vmatprep.mubr.bf16.mxu1 %v1204_v3 }
  0x23   : > { %1096 = vmatmul.mubr.msk.bf16.vlgmr.msra.gmra.mxu0 %vm473_vm1, %v440_v19 }
  0x24   : > { %754 = vmatprep.mubr.bf16.mxu0 %v1204_v3 }
  0x8a   : > { %v445_v26 = vpop.permute.xlu0 %444  ;;  %v654_v2 = vpop.permute.xlu1 %653 }
  0x8e   : > { %v649_v63 = vpop.permute.xlu0 %648 }
  0xdb   : > { %v527_v24 = vpop.f32.mrf.mxu0 }
  0xdc   : > { %v528_v29 = vadd.f32 %v527_v24, %v445_v26 }
  0xdd   : > { %v529_v27 = vpop.f32.mrf.mxu0  ;;  %v568_v28 = vpop.f32.mrf.mxu1 }
  0xde   : > { %v530_v30 = vadd.f32 %v529_v27, %v445_v26  ;;  %v569_v36 = vadd.f32 %v568_v28, %v445_v26 }
  0xdf   : > { %v531_v32 = vpop.f32.mrf.mxu0  ;;  %v570_v33 = vpop.f32.mrf.mxu1 }
  0xe0   : > { %v624_v35 = vcombine.low %v528_v29, %v530_v30  ;;  %v571_v37 = vadd.f32 %v570_v33, %v445_v26 }
  0xe1   : > { %v532_v39 = vpop.f32.mrf.mxu0  ;;  %v572_v40 = vpop.f32.mrf.mxu1 }
  0xe2   : > { %v628_v41 = vadd.f32 %v624_v35, %v617_v31  ;;  %v625_v42 = vcombine.low %v569_v36, %v571_v37 }
  0xe3   : > { %v573_v44 = vpop.f32.mrf.mxu1  ;;  %v609_v45 = vpop.f32.mrf.mxu0 }
  0xe4   : > { %v633_v46 = vcombine.high %v628_v41, %v628_v41  ;;  %v629_v47 = vadd.f32 %v625_v42, %v618_v38  ;;  %v610_v48 = vadd.f32 %v609_v45, %v445_v26  ;;  %v637_v49 = vpack.c.bf16 %v628_v41, %v628_v41 }
  0xe5   : > { %v1097_v50 = vpop.f32.mrf.mxu0 }
  0xe6   : > { %v638_v51 = vpack.c.bf16 %v633_v46, %v633_v46  ;;  %v634_v52 = vcombine.high %v629_v47, %v629_v47  ;;  %v630_v53 = vadd.f32 %v619_v43, %v610_v48  ;;  %v639_v55 = vpack.c.bf16 %v629_v47, %v629_v47 }
  0xe7   : > { %v612_v54 = vpop.f32.mrf.mxu0  ;;  %v665_v58 = vsel %vm477_vm0, %v637_v49, 0 }
  0xe8   : > { %v640_v56 = vpack.c.bf16 %v634_v52, %v634_v52  ;;  %v641_v57 = vpack.c.bf16 %v630_v53, %v630_v53  ;;  %1071 = vmatprep.subr.msk.bf16.mxu1 %vm477_vm0, %v638_v51  ;;  %v671_v61 = vsel %vm477_vm0, %v639_v55, 0  ;;  %v866_v53 = vld [vmem:[%s1332_s15] sm:$0xff]  ;;  %v867_v55 = vld [vmem:[%s1332_s15 + $0x8] sm:$0xff] }
  0xe9   : > { %v1098_v60 = vpop.f32.mrf.mxu0  ;;  %694 = vmatpush1.bf16.msra.mxu1 %v665_v58 }
  0xea   : > { %1073 = vmatprep.subr.msk.bf16.mxu0 %vm477_vm0, %v640_v56  ;;  %1099 = vmatprep.subr.bf16.mxu1 %v1205_v20  ;;  %v677_v62 = vsel %vm477_vm0, %v641_v57, 0  ;;  %v868_v56 = vld [vmem:[%s1332_s15 + $0x10] sm:$0xff]  ;;  %v891_v60 = vpop.permute.xlu1 %890 }
  0xeb   : > { %737 = vmatpush1.bf16.msra.mxu0 %v671_v61 }
  0xec   : > { %1072 = vmatmul.mubr.msk.bf16.vlgmr.msra.gmra.mxu1 %vm473_vm1, %v1138_v59 }
  0xed   : > { %1100 = vmatpush3.bf16.msra.mxu1 %v677_v62  ;;  %1101 = vmatprep.mubr.msk.bf16.mxu1 %vm1206_vm2, %v1205_v20  ;;  %v869_v62 = vld [vmem:[%s1332_s15 + $0x18] sm:$0xff] }
  0xee   : > { %1074 = vmatmul.mubr.msk.bf16.vlgmr.msra.gmra.mxu0 %vm473_vm1, %v1138_v59 }
  0xf4   : > { %1102 = vmatmul.mubr.msk.bf16.vlgmr.msra.gmra.mxu1 %vm473_vm1, %v1138_v59  ;;  %v871_v59 = vld [vmem:[%s1332_s15 + $0x28] sm:$0xff] }
 0x1ac   : > { %v713_v0 = vpop.f32.mrf.mxu1 }
 0x1ad   : > { %v714_v1 = vadd.f32 %v713_v0, %v649_v63 }
 0x1ae   : > { %v715_v3 = vpop.f32.mrf.mxu1  ;;  %v756_v4 = vpop.f32.mrf.mxu0 }
 0x1af   : > { %v1076_v5 = vmul.f32 -1.442695, %v714_v1  ;;  %v716_v6 = vadd.f32 %v715_v3, %v649_v63  ;;  %v757_v7 = vadd.f32 %v756_v4, %v649_v63 }
 0x1b0   : > { %v717_v8 = vpop.f32.mrf.mxu1  ;;  %v758_v9 = vpop.f32.mrf.mxu0 }
 0x1b1   : > { %1139 = vpow2.f32 %v1076_v5  ;;  %v1077_v10 = vmul.f32 -1.442695, %v716_v6  ;;  %v1078_v11 = vmul.f32 -1.442695, %v757_v7  ;;  %v718_v12 = vadd.f32 %v717_v8, %v654_v2  ;;  %v873_v6 = vld [vmem:[%s1332_s15 + $0x38] sm:$0xff] }
 0x1b2   : > { %v759_v13 = vadd.f32 %v758_v9, %v649_v63  ;;  %v719_v14 = vpop.f32.mrf.mxu1  ;;  %v760_v15 = vpop.f32.mrf.mxu0 }
 0x1b3   : > { %1141 = vpow2.f32 %v1077_v10  ;;  %v1081_v16 = vmul.f32 -1.442695, %v718_v12  ;;  %v720_v17 = vadd.f32 %v719_v14, %v654_v2  ;;  %v761_v18 = vadd.f32 %v760_v15, %v654_v2  ;;  %v896_v9 = vpop.permute.xlu0 %895  ;;  %v874_v10 = vld [vmem:[%s1332_s15 + $0x40] sm:$0xff] }
 0x1b4   : > { %1143 = vpow2.f32 %v1078_v11  ;;  %v1079_v19 = vmul.f32 -1.442695, %v759_v13  ;;  %v762_v20 = vpop.f32.mrf.mxu0  ;;  %v799_v21 = vpop.f32.mrf.mxu1 }
 0x1b5   : > { %1145 = vpow2.f32 %v1081_v16  ;;  %v1082_v22 = vmul.f32 -1.442695, %v720_v17  ;;  %v1083_v23 = vmul.f32 -1.442695, %v761_v18  ;;  %v763_v24 = vadd.f32 %v762_v20, %v654_v2  ;;  %v870_v16 = vld [vmem:[%s1332_s15 + $0x20] sm:$0xff] }
 0x1b6   : > { %1147 = vpow2.f32 %v1079_v19  ;;  %v800_v25 = vadd.f32 %v799_v21, %v649_v63  ;;  %v1103_v26 = vpop.f32.mrf.mxu1 }
 0x1b7   : > { %1149 = vpow2.f32 %v1082_v22  ;;  %v1084_v27 = vmul.f32 -1.442695, %v763_v24  ;;  %v875_v24 = vld [vmem:[%s1332_s15 + $0x48] sm:$0xff] }
 0x1b8   : > { %1151 = vpow2.f32 %v1083_v23  ;;  %v1080_v28 = vmul.f32 -1.442695, %v800_v25  ;;  %v802_v29 = vpop.f32.mrf.mxu1 }
 0x1b9   : > { %1153 = vpow2.f32 %v1084_v27  ;;  %v803_v30 = vadd.f32 %v802_v29, %v654_v2  ;;  %v872_v2 = vld [vmem:[%s1332_s15 + $0x30] sm:$0xff] }
 0x1ba   : > { %1155 = vpow2.f32 %v1080_v28  ;;  %v1104_v31 = vpop.f32.mrf.mxu1 }
 0x1bb   : > { %v1085_v32 = vmul.f32 -1.442695, %v803_v30 }
 0x1bd   : > { %1157 = vpow2.f32 %v1085_v32 }
 0x1be   : > { %v1140_v33 = vpop.eup %1139 }
 0x1bf   : > { %v836_v34 = vadd.f32 1.0, %v1140_v33 }
 0x1c0   : > { %v1142_v35 = vpop.eup %1141 }
 0x1c1   : > { %v1144_v36 = vpop.eup %1143  ;;  %1159 = vrcp.f32 %v836_v34  ;;  %v837_v37 = vadd.f32 1.0, %v1142_v35 }
 0x1c2   : > { %v1146_v38 = vpop.eup %1145  ;;  %v838_v39 = vadd.f32 1.0, %v1144_v36 }
 0x1c3   : > { %v1148_v40 = vpop.eup %1147  ;;  %1161 = vrcp.f32 %v837_v37  ;;  %v841_v41 = vadd.f32 1.0, %v1146_v38 }
 0x1c4   : > { %v1150_v42 = vpop.eup %1149  ;;  %1163 = vrcp.f32 %v838_v39  ;;  %v839_v43 = vadd.f32 1.0, %v1148_v40 }
 0x1c5   : > { %v1152_v44 = vpop.eup %1151  ;;  %1165 = vrcp.f32 %v841_v41  ;;  %v842_v45 = vadd.f32 1.0, %v1150_v42 }
 0x1c6   : > { %v1154_v46 = vpop.eup %1153  ;;  %1167 = vrcp.f32 %v839_v43  ;;  %v843_v47 = vadd.f32 1.0, %v1152_v44 }
 0x1c7   : > { %v1156_v48 = vpop.eup %1155  ;;  %1169 = vrcp.f32 %v842_v45  ;;  %v844_v49 = vadd.f32 1.0, %v1154_v46 }
 0x1c8   : > { %1171 = vrcp.f32 %v843_v47  ;;  %v840_v50 = vadd.f32 1.0, %v1156_v48 }
 0x1c9   : > { %1173 = vrcp.f32 %v844_v49 }
 0x1ca   : > { %v1158_v51 = vpop.eup %1157  ;;  %1175 = vrcp.f32 %v840_v50 }
 0x1cb   : > { %v845_v52 = vadd.f32 1.0, %v1158_v51 }
 0x1cd   : > { %1177 = vrcp.f32 %v845_v52 }
 0x1ce   : > { %v1160_v54 = vpop.eup %1159 }
 0x1cf   : > { %v876_v57 = vmul.f32 %v1160_v54, %v866_v53 }
 0x1d0   : > { %v1162_v58 = vpop.eup %1161 }
 0x1d1   : > { %v1164_v61 = vpop.eup %1163  ;;  %v877_v63 = vmul.f32 %v1162_v58, %v867_v55  ;;  %v898_v0 = vmul.f32 %v891_v60, %v876_v57 }
 0x1d2   : > { %v1166_v1 = vpop.eup %1165  ;;  %v878_v3 = vmul.f32 %v1164_v61, %v868_v56 }
 0x1d3   : > { %v1168_v4 = vpop.eup %1167  ;;  %v881_v5 = vmul.f32 %v1166_v1, %v871_v59  ;;  %v899_v7 = vmul.f32 %v891_v60, %v877_v63  ;;  %908 = vst [vmem:[%s1340_s17] sm:$0xff] %v898_v0 }
 0x1d4   : > { %v1170_v8 = vpop.eup %1169  ;;  %v879_v11 = vmul.f32 %v1168_v4, %v869_v62  ;;  %v900_v12 = vmul.f32 %v891_v60, %v878_v3 }
 0x1d5   : > { %v1172_v13 = vpop.eup %1171  ;;  %v903_v14 = vmul.f32 %v896_v9, %v881_v5  ;;  %v882_v15 = vmul.f32 %v1170_v8, %v872_v2  ;;  %909 = vst [vmem:[%s1340_s17 + $0x8] sm:$0xff] %v899_v7 }
 0x1d6   : > { %v1174_v17 = vpop.eup %1173  ;;  %v883_v18 = vmul.f32 %v1172_v13, %v873_v6  ;;  %v901_v19 = vmul.f32 %v891_v60, %v879_v11  ;;  %910 = vst [vmem:[%s1340_s17 + $0x10] sm:$0xff] %v900_v12 }
 0x1d7   : > { %v1176_v20 = vpop.eup %1175  ;;  %913 = vst [vmem:[%s1340_s17 + $0x28] sm:$0xff] %v903_v14  ;;  %v904_v21 = vmul.f32 %v896_v9, %v882_v15  ;;  %v884_v22 = vmul.f32 %v1174_v17, %v874_v10 }
 0x1d8   : > { %v905_v23 = vmul.f32 %v896_v9, %v883_v18  ;;  %v880_v25 = vmul.f32 %v1176_v20, %v870_v16  ;;  %911 = vst [vmem:[%s1340_s17 + $0x18] sm:$0xff] %v901_v19 }
 0x1d9   : > { %914 = vst [vmem:[%s1340_s17 + $0x30] sm:$0xff] %v904_v21  ;;  %v906_v26 = vmul.f32 %v896_v9, %v884_v22 }
 0x1da   : > { %v1178_v27 = vpop.eup %1177  ;;  %915 = vst [vmem:[%s1340_s17 + $0x38] sm:$0xff] %v905_v23  ;;  %v902_v28 = vmul.f32 %v891_v60, %v880_v25 }
 0x1db   : > { %916 = vst [vmem:[%s1340_s17 + $0x40] sm:$0xff] %v906_v26  ;;  %v885_v29 = vmul.f32 %v1178_v27, %v875_v24 }
 0x1dc   : > { %912 = vst [vmem:[%s1340_s17 + $0x20] sm:$0xff] %v902_v28 }
 0x1dd   : > { %v907_v30 = vmul.f32 %v896_v9, %v885_v29 }
 0x1df   : > { %917 = vst [vmem:[%s1340_s17 + $0x48] sm:$0xff] %v907_v30 }
 0x1e0 PF: > { %s18_s29 = sadd.s32 1, %s1201_s29   ;;  %s1377_s27 = smov %s1197_s28 }
 0x1e1   : > { %p15_p5 = scmp.ge.s32.totalorder %s18_s29, 4   ;;  %s1378_s28 = smov %s1380_s30 }
 0x1e3   :  { %17 = sbr.rel (!%p15_p5) target bundleno = 2 (0x2), region = 91 }

</bundles_post_ra>
